<compile_context>
chip_gen: v7x
topology: tpu7x:2x2x1
jax: 0.10.0
libtpu: 0.0.40
codegen_flags: <defaults>
</compile_context>

<pallas_src>
import jax
import jax.numpy as jnp
from jax import lax
from jax.experimental import pallas as pl
from jax.experimental.pallas import tpu as pltpu

# ---- cfg-like constants (synthetic, defined in-script) ----------------------
ACTION_SPACE = 6
TEMPORAL_CONTEXT = True
TEMPORAL_CTX = ACTION_SPACE + 1
FEATURE_DIM = (133 + TEMPORAL_CTX) if TEMPORAL_CONTEXT else 133   # 140
FF_DIM = 256                      # input_layer1 out features
HIDDEN_LSTM = 32                  # hidden_size_LSTM
GATE_DIM = 4 * HIDDEN_LSTM        # 128 (one full vreg of lanes)
OUTPUT_SIZE = ACTION_SPACE        # output_size
SEQ_LEN = 8                       # T (sequence length)
EXTRA_FEATS = 10                  # extra trailing input columns (ignored)
INPUT_DIM = FEATURE_DIM + EXTRA_FEATS   # 150 (full width fed to the kernel)
LN_EPS = 1e-5


# ---- Pallas kernel -----------------------------------------------------------
def dqn_lstm_kernel(x_ref, w1_ref, b1_ref, wih_ref, whh_ref, wout_ref, aux_ref,
                    y_ref, hc_ref):
    H = HIDDEN_LSTM
    G = GATE_DIM
    T = x_ref.shape[0]

    # input_layer1 + ReLU : (T, 150) @ (150, 256) + b1 -> (T, 256)
    # (rows of w1 beyond FEATURE_DIM are zero => identical to slicing inputs)
    x1 = jnp.maximum(
        jnp.dot(x_ref[...], w1_ref[...], preferred_element_type=jnp.float32)
        + b1_ref[...], 0.0)

    # Input-side gate pre-activations for all timesteps: (T, 4H) = (8, 128).
    # b_ih + b_hh are folded into aux row 0. Lives in vregs (no scratch).
    gx = (jnp.dot(x1, wih_ref[...], preferred_element_type=jnp.float32)
          + aux_ref[0:1, :])

    whh = whh_ref[...]              # (4H, 4H); rows >= H are zero padding

    # Static lane-id masks. PyTorch gate order is i, f, g, o.
    lane = lax.broadcasted_iota(jnp.int32, (1, G), 1)
    g_blk = (lane >= 2 * H) & (lane < 3 * H)     # tanh block
    valid = lane < H                             # valid hidden lanes

    # Recurrent state carried in vregs at full 128-lane width.  Lanes >= H
    # hold bounded garbage that is killed by the zero rows of whh / wout.
    h = aux_ref[2:3, :]
    c = aux_ref[3:4, :]

    outs = []
    for t in range(T):              # T is static -> fully unrolled recurrence
        gates = gx[t:t + 1, :] + jnp.dot(h, whh,
                                         preferred_element_type=jnp.float32)
        # One full-width sigmoid + one full-width tanh instead of four narrow
        # 32-lane activations; block alignment goes to the XLU via roll.
        acts = jnp.where(g_blk, jnp.tanh(gates), jax.nn.sigmoid(gates))
        i_v = acts                                    # i block at lanes 0..H
        f_v = pltpu.roll(acts, shift=3 * H, axis=1)   # f block -> lanes 0..H
        g_v = pltpu.roll(acts, shift=2 * H, axis=1)   # g block -> lanes 0..H
        o_v = pltpu.roll(acts, shift=H, axis=1)       # o block -> lanes 0..H
        c = f_v * c + i_v * g_v
        h = o_v * jnp.tanh(c)
        outs.append(h)

    out_full = jnp.concatenate(outs, axis=0)          # (T, 4H); valid lanes < H

    # Masked LayerNorm over the hidden dim (gamma/beta folded into wout/bout).
    inv_h = 1.0 / H
    mean = jnp.sum(jnp.where(valid, out_full, 0.0),
                   axis=-1, keepdims=True) * inv_h
    diff = out_full - mean
    var = jnp.sum(jnp.where(valid, diff * diff, 0.0),
                  axis=-1, keepdims=True) * inv_h
    normed = diff * lax.rsqrt(var + LN_EPS)           # garbage lanes killed below

    # Output projection: lane-dense (T, 128) store; real Q-values are columns
    # [0, OUTPUT_SIZE), sliced in the wrapper.
    y_ref[...] = (jnp.dot(normed, wout_ref[...],
                          preferred_element_type=jnp.float32)
                  + aux_ref[1:2, :])
    hc_ref[...] = jnp.concatenate([h, c], axis=0)     # (2, 4H) lane-dense


# ---- One-time parameter preprocessing ----------------------------------------
def prepare_params(params):
    """Fold LayerNorm affine into the output layer and zero-pad weights to
    lane/MXU friendly shapes. Call once; results are reusable every forward."""
    H, G = HIDDEN_LSTM, GATE_DIM
    f32 = jnp.float32
    # zero rows for the trailing input columns the module slices away
    w1p = jnp.zeros((INPUT_DIM, FF_DIM), f32).at[:FEATURE_DIM, :].set(params["w1"])
    # zero rows >= H so the full-width recurrent state needs no slicing
    whhp = jnp.zeros((G, G), f32).at[:H, :].set(params["w_hh"])
    # fold LayerNorm gamma/beta into the output projection
    w_out_sc = params["gamma"][0][:, None] * params["w_out"]             # (H, OUT)
    b_out_f = params["beta"][0] @ params["w_out"] + params["b_out"][0]   # (OUT,)
    woutp = jnp.zeros((G, G), f32).at[:H, :OUTPUT_SIZE].set(w_out_sc)
    bias_rows = jnp.zeros((2, G), f32)
    bias_rows = bias_rows.at[0, :].set(params["b_lstm"][0])
    bias_rows = bias_rows.at[1, :OUTPUT_SIZE].set(b_out_f)
    return {"w1p": w1p, "b1": params["b1"], "wih": params["w_ih"],
            "whhp": whhp, "woutp": woutp, "bias_rows": bias_rows}


# ---- Wrapper -----------------------------------------------------------------
def dqn_lstm_forward(inputs, hidden, prep):
    h0, c0 = hidden
    T = inputs.shape[0]
    H, G = HIDDEN_LSTM, GATE_DIM

    # Pack the per-call state together with the two prepared bias rows into a
    # single small lane-aligned aux input (fewer DMA descriptors in prologue).
    state = jnp.pad(jnp.concatenate([h0, c0], axis=0), ((0, 0), (0, G - H)))
    aux = jnp.concatenate([prep["bias_rows"], state], axis=0)       # (4, G)

    def vmem():
        return pl.BlockSpec(memory_space=pltpu.MemorySpace.VMEM)

    args = (inputs, prep["w1p"], prep["b1"], prep["wih"], prep["whhp"],
            prep["woutp"], aux)

    y_pad, hc = pl.pallas_call(
        dqn_lstm_kernel,
        out_shape=(jax.ShapeDtypeStruct((T, G), jnp.float32),   # lane-dense y
                   jax.ShapeDtypeStruct((2, G), jnp.float32)),  # [h; c]
        in_specs=[vmem() for _ in args],
        out_specs=(vmem(), vmem()),
    )(*args)

    y = y_pad[:, :OUTPUT_SIZE]
    hx = hc[0:1, :H]
    cx = hc[1:2, :H]
    return y, (hx, cx)


# ---- Pure-JAX reference (for verification) -----------------------------------
def reference_forward(inputs, hidden, params):
    H = HIDDEN_LSTM
    x = inputs[:, :FEATURE_DIM]
    x1 = jax.nn.relu(x @ params["w1"] + params["b1"][0])
    gx_all = x1 @ params["w_ih"] + params["b_lstm"][0]
    h0 = hidden[0][0]
    c0 = hidden[1][0]

    def step(carry, gx):
        h, c = carry
        gates = gx + h @ params["w_hh"]
        i = jax.nn.sigmoid(gates[0 * H:1 * H])
        f = jax.nn.sigmoid(gates[1 * H:2 * H])
        g = jnp.tanh(gates[2 * H:3 * H])
        o = jax.nn.sigmoid(gates[3 * H:4 * H])
        c_new = f * c + i * g
        h_new = o * jnp.tanh(c_new)
        return (h_new, c_new), h_new

    (hT, cT), outs = lax.scan(step, (h0, c0), gx_all)
    mean = outs.mean(-1, keepdims=True)
    var = ((outs - mean) ** 2).mean(-1, keepdims=True)
    normed = (outs - mean) / jnp.sqrt(var + LN_EPS)
    normed = normed * params["gamma"][0] + params["beta"][0]
    y = normed @ params["w_out"] + params["b_out"][0]
    return y, (hT[None, :], cT[None, :])


# ---- Deterministic parameter construction ------------------------------------
def make_params(key):
    ks = jax.random.split(key, 10)
    s = 0.1
    # NOTE: original module uses xavier/orthogonal init; deterministic random
    # values of the correct shapes suffice for this synthetic kernel.
    return {
        "w1":     s * jax.random.normal(ks[0], (FEATURE_DIM, FF_DIM), jnp.float32),
        "b1":     s * jax.random.normal(ks[1], (1, FF_DIM), jnp.float32),
        "w_ih":   s * jax.random.normal(ks[2], (FF_DIM, 4 * HIDDEN_LSTM), jnp.float32),
        "w_hh":   s * jax.random.normal(ks[3], (HIDDEN_LSTM, 4 * HIDDEN_LSTM), jnp.float32),
        "b_lstm": s * jax.random.normal(ks[4], (1, 4 * HIDDEN_LSTM), jnp.float32),
        "gamma":  1.0 + s * jax.random.normal(ks[5], (1, HIDDEN_LSTM), jnp.float32),
        "beta":   s * jax.random.normal(ks[6], (1, HIDDEN_LSTM), jnp.float32),
        "w_out":  s * jax.random.normal(ks[7], (HIDDEN_LSTM, OUTPUT_SIZE), jnp.float32),
        "b_out":  s * jax.random.normal(ks[8], (1, OUTPUT_SIZE), jnp.float32),
    }


if __name__ == "__main__":
    key = jax.random.PRNGKey(0)
    k_in, k_h, k_c, k_p = jax.random.split(key, 4)

    inputs = jax.random.normal(k_in, (SEQ_LEN, INPUT_DIM), jnp.float32)
    h0 = jax.random.normal(k_h, (1, HIDDEN_LSTM), jnp.float32)
    c0 = jax.random.normal(k_c, (1, HIDDEN_LSTM), jnp.float32)
    params = make_params(k_p)
    prep = prepare_params(params)          # one-time weight prep

    y, (hx, cx) = dqn_lstm_forward(inputs, (h0, c0), prep)
    jax.block_until_ready((y, hx, cx))

    y_ref, (hx_ref, cx_ref) = reference_forward(inputs, (h0, c0), params)
    assert y.shape == (SEQ_LEN, OUTPUT_SIZE)
    assert hx.shape == (1, HIDDEN_LSTM) and cx.shape == (1, HIDDEN_LSTM)
    assert jnp.allclose(y, y_ref, atol=2e-3, rtol=2e-3)
    assert jnp.allclose(hx, hx_ref, atol=2e-3, rtol=2e-3)
    assert jnp.allclose(cx, cx_ref, atol=2e-3, rtol=2e-3)

    print("KERNEL_OK")
</pallas_src>

<mosaic_0001>
module attributes {stable_mosaic.version = 11 : i64} {
  func.func @dqn_lstm_kernel(%arg0: memref<8x150xf32, #tpu.memory_space<vmem>>, %arg1: memref<150x256xf32, #tpu.memory_space<vmem>>, %arg2: memref<1x256xf32, #tpu.memory_space<vmem>>, %arg3: memref<256x128xf32, #tpu.memory_space<vmem>>, %arg4: memref<128x128xf32, #tpu.memory_space<vmem>>, %arg5: memref<128x128xf32, #tpu.memory_space<vmem>>, %arg6: memref<4x128xf32, #tpu.memory_space<vmem>>, %arg7: memref<8x128xf32, #tpu.memory_space<vmem>>, %arg8: memref<2x128xf32, #tpu.memory_space<vmem>>) attributes {dimension_semantics = [], scalar_prefetch = 0 : i64, scratch_operands = 0 : i64, tpu.core_type = #tpu.core_type<tc>} {
    %c0 = arith.constant 0 : index
    %c0_0 = arith.constant 0 : index
    %0 = vector.load %arg0[%c0, %c0_0] : memref<8x150xf32, #tpu.memory_space<vmem>>, vector<8x150xf32>
    %c0_1 = arith.constant 0 : index
    %c0_2 = arith.constant 0 : index
    %1 = vector.load %arg1[%c0_1, %c0_2] : memref<150x256xf32, #tpu.memory_space<vmem>>, vector<150x256xf32>
    %cst = arith.constant dense<0.000000e+00> : vector<8x256xf32>
    %2 = tpu.matmul %0, %1, %cst {dimension_numbers = #tpu.dot_dimension_numbers<[1], [0], [0], [1], [0, 0, 1, 1], [], []>} : vector<8x150xf32>, vector<150x256xf32>, vector<8x256xf32> -> vector<8x256xf32>
    %c0_3 = arith.constant 0 : index
    %c0_4 = arith.constant 0 : index
    %3 = vector.load %arg2[%c0_3, %c0_4] : memref<1x256xf32, #tpu.memory_space<vmem>>, vector<1x256xf32>
    %4 = vector.broadcast %3 : vector<1x256xf32> to vector<8x256xf32>
    %5 = arith.addf %2, %4 : vector<8x256xf32>
    %cst_5 = arith.constant 0.000000e+00 : f32
    %6 = vector.broadcast %cst_5 : f32 to vector<8x256xf32>
    %7 = arith.maximumf %5, %6 : vector<8x256xf32>
    %c0_6 = arith.constant 0 : index
    %c0_7 = arith.constant 0 : index
    %8 = vector.load %arg3[%c0_6, %c0_7] : memref<256x128xf32, #tpu.memory_space<vmem>>, vector<256x128xf32>
    %cst_8 = arith.constant dense<0.000000e+00> : vector<8x128xf32>
    %9 = tpu.matmul %7, %8, %cst_8 {dimension_numbers = #tpu.dot_dimension_numbers<[1], [0], [0], [1], [0, 0, 1, 1], [], []>} : vector<8x256xf32>, vector<256x128xf32>, vector<8x128xf32> -> vector<8x128xf32>
    %c0_9 = arith.constant 0 : index
    %c0_10 = arith.constant 0 : index
    %10 = vector.load %arg6[%c0_9, %c0_10] : memref<4x128xf32, #tpu.memory_space<vmem>>, vector<1x128xf32>
    %11 = vector.broadcast %10 : vector<1x128xf32> to vector<8x128xf32>
    %12 = arith.addf %9, %11 : vector<8x128xf32>
    %c0_11 = arith.constant 0 : index
    %c0_12 = arith.constant 0 : index
    %13 = vector.load %arg4[%c0_11, %c0_12] : memref<128x128xf32, #tpu.memory_space<vmem>>, vector<128x128xf32>
    %14 = tpu.iota {dimensions = array<i32: 1>} : vector<1x128xi32>
    %c64_i32 = arith.constant 64 : i32
    %15 = vector.broadcast %c64_i32 : i32 to vector<1x128xi32>
    %16 = arith.cmpi sge, %14, %15 : vector<1x128xi32>
    %c96_i32 = arith.constant 96 : i32
    %17 = vector.broadcast %c96_i32 : i32 to vector<1x128xi32>
    %18 = arith.cmpi slt, %14, %17 : vector<1x128xi32>
    %19 = arith.andi %16, %18 : vector<1x128xi1>
    %c32_i32 = arith.constant 32 : i32
    %20 = vector.broadcast %c32_i32 : i32 to vector<1x128xi32>
    %21 = arith.cmpi slt, %14, %20 : vector<1x128xi32>
    %c2 = arith.constant 2 : index
    %c0_13 = arith.constant 0 : index
    %22 = vector.load %arg6[%c2, %c0_13] : memref<4x128xf32, #tpu.memory_space<vmem>>, vector<1x128xf32>
    %c3 = arith.constant 3 : index
    %c0_14 = arith.constant 0 : index
    %23 = vector.load %arg6[%c3, %c0_14] : memref<4x128xf32, #tpu.memory_space<vmem>>, vector<1x128xf32>
    %24 = vector.extract_strided_slice %12 {offsets = [0, 0], sizes = [1, 128], strides = [1, 1]} : vector<8x128xf32> to vector<1x128xf32>
    %cst_15 = arith.constant dense<0.000000e+00> : vector<1x128xf32>
    %25 = tpu.matmul %22, %13, %cst_15 {dimension_numbers = #tpu.dot_dimension_numbers<[1], [0], [0], [1], [0, 0, 1, 1], [], []>} : vector<1x128xf32>, vector<128x128xf32>, vector<1x128xf32> -> vector<1x128xf32>
    %26 = arith.addf %24, %25 : vector<1x128xf32>
    %27 = math.tanh %26 : vector<1x128xf32>
    %28 = arith.negf %26 : vector<1x128xf32>
    %29 = math.exp %28 : vector<1x128xf32>
    %cst_16 = arith.constant 1.000000e+00 : f32
    %30 = vector.broadcast %cst_16 : f32 to vector<1x128xf32>
    %31 = arith.addf %30, %29 : vector<1x128xf32>
    %32 = arith.divf %30, %31 : vector<1x128xf32>
    %33 = arith.select %19, %27, %32 : vector<1x128xi1>, vector<1x128xf32>
    %c96_i32_17 = arith.constant 96 : i32
    %34 = tpu.dynamic_rotate %33 by %c96_i32_17 dim 1 : vector<1x128xf32>, i32 -> vector<1x128xf32>
    %c64_i32_18 = arith.constant 64 : i32
    %35 = tpu.dynamic_rotate %33 by %c64_i32_18 dim 1 : vector<1x128xf32>, i32 -> vector<1x128xf32>
    %c32_i32_19 = arith.constant 32 : i32
    %36 = tpu.dynamic_rotate %33 by %c32_i32_19 dim 1 : vector<1x128xf32>, i32 -> vector<1x128xf32>
    %37 = arith.mulf %34, %23 : vector<1x128xf32>
    %38 = arith.mulf %33, %35 : vector<1x128xf32>
    %39 = arith.addf %37, %38 : vector<1x128xf32>
    %40 = math.tanh %39 : vector<1x128xf32>
    %41 = arith.mulf %36, %40 : vector<1x128xf32>
    %42 = vector.extract_strided_slice %12 {offsets = [1, 0], sizes = [1, 128], strides = [1, 1]} : vector<8x128xf32> to vector<1x128xf32>
    %cst_20 = arith.constant dense<0.000000e+00> : vector<1x128xf32>
    %43 = tpu.matmul %41, %13, %cst_20 {dimension_numbers = #tpu.dot_dimension_numbers<[1], [0], [0], [1], [0, 0, 1, 1], [], []>} : vector<1x128xf32>, vector<128x128xf32>, vector<1x128xf32> -> vector<1x128xf32>
    %44 = arith.addf %42, %43 : vector<1x128xf32>
    %45 = math.tanh %44 : vector<1x128xf32>
    %46 = arith.negf %44 : vector<1x128xf32>
    %47 = math.exp %46 : vector<1x128xf32>
    %cst_21 = arith.constant 1.000000e+00 : f32
    %48 = vector.broadcast %cst_21 : f32 to vector<1x128xf32>
    %49 = arith.addf %48, %47 : vector<1x128xf32>
    %50 = arith.divf %48, %49 : vector<1x128xf32>
    %51 = arith.select %19, %45, %50 : vector<1x128xi1>, vector<1x128xf32>
    %c96_i32_22 = arith.constant 96 : i32
    %52 = tpu.dynamic_rotate %51 by %c96_i32_22 dim 1 : vector<1x128xf32>, i32 -> vector<1x128xf32>
    %c64_i32_23 = arith.constant 64 : i32
    %53 = tpu.dynamic_rotate %51 by %c64_i32_23 dim 1 : vector<1x128xf32>, i32 -> vector<1x128xf32>
    %c32_i32_24 = arith.constant 32 : i32
    %54 = tpu.dynamic_rotate %51 by %c32_i32_24 dim 1 : vector<1x128xf32>, i32 -> vector<1x128xf32>
    %55 = arith.mulf %52, %39 : vector<1x128xf32>
    %56 = arith.mulf %51, %53 : vector<1x128xf32>
    %57 = arith.addf %55, %56 : vector<1x128xf32>
    %58 = math.tanh %57 : vector<1x128xf32>
    %59 = arith.mulf %54, %58 : vector<1x128xf32>
    %60 = vector.extract_strided_slice %12 {offsets = [2, 0], sizes = [1, 128], strides = [1, 1]} : vector<8x128xf32> to vector<1x128xf32>
    %cst_25 = arith.constant dense<0.000000e+00> : vector<1x128xf32>
    %61 = tpu.matmul %59, %13, %cst_25 {dimension_numbers = #tpu.dot_dimension_numbers<[1], [0], [0], [1], [0, 0, 1, 1], [], []>} : vector<1x128xf32>, vector<128x128xf32>, vector<1x128xf32> -> vector<1x128xf32>
    %62 = arith.addf %60, %61 : vector<1x128xf32>
    %63 = math.tanh %62 : vector<1x128xf32>
    %64 = arith.negf %62 : vector<1x128xf32>
    %65 = math.exp %64 : vector<1x128xf32>
    %cst_26 = arith.constant 1.000000e+00 : f32
    %66 = vector.broadcast %cst_26 : f32 to vector<1x128xf32>
    %67 = arith.addf %66, %65 : vector<1x128xf32>
    %68 = arith.divf %66, %67 : vector<1x128xf32>
    %69 = arith.select %19, %63, %68 : vector<1x128xi1>, vector<1x128xf32>
    %c96_i32_27 = arith.constant 96 : i32
    %70 = tpu.dynamic_rotate %69 by %c96_i32_27 dim 1 : vector<1x128xf32>, i32 -> vector<1x128xf32>
    %c64_i32_28 = arith.constant 64 : i32
    %71 = tpu.dynamic_rotate %69 by %c64_i32_28 dim 1 : vector<1x128xf32>, i32 -> vector<1x128xf32>
    %c32_i32_29 = arith.constant 32 : i32
    %72 = tpu.dynamic_rotate %69 by %c32_i32_29 dim 1 : vector<1x128xf32>, i32 -> vector<1x128xf32>
    %73 = arith.mulf %70, %57 : vector<1x128xf32>
    %74 = arith.mulf %69, %71 : vector<1x128xf32>
    %75 = arith.addf %73, %74 : vector<1x128xf32>
    %76 = math.tanh %75 : vector<1x128xf32>
    %77 = arith.mulf %72, %76 : vector<1x128xf32>
    %78 = vector.extract_strided_slice %12 {offsets = [3, 0], sizes = [1, 128], strides = [1, 1]} : vector<8x128xf32> to vector<1x128xf32>
    %cst_30 = arith.constant dense<0.000000e+00> : vector<1x128xf32>
    %79 = tpu.matmul %77, %13, %cst_30 {dimension_numbers = #tpu.dot_dimension_numbers<[1], [0], [0], [1], [0, 0, 1, 1], [], []>} : vector<1x128xf32>, vector<128x128xf32>, vector<1x128xf32> -> vector<1x128xf32>
    %80 = arith.addf %78, %79 : vector<1x128xf32>
    %81 = math.tanh %80 : vector<1x128xf32>
    %82 = arith.negf %80 : vector<1x128xf32>
    %83 = math.exp %82 : vector<1x128xf32>
    %cst_31 = arith.constant 1.000000e+00 : f32
    %84 = vector.broadcast %cst_31 : f32 to vector<1x128xf32>
    %85 = arith.addf %84, %83 : vector<1x128xf32>
    %86 = arith.divf %84, %85 : vector<1x128xf32>
    %87 = arith.select %19, %81, %86 : vector<1x128xi1>, vector<1x128xf32>
    %c96_i32_32 = arith.constant 96 : i32
    %88 = tpu.dynamic_rotate %87 by %c96_i32_32 dim 1 : vector<1x128xf32>, i32 -> vector<1x128xf32>
    %c64_i32_33 = arith.constant 64 : i32
    %89 = tpu.dynamic_rotate %87 by %c64_i32_33 dim 1 : vector<1x128xf32>, i32 -> vector<1x128xf32>
    %c32_i32_34 = arith.constant 32 : i32
    %90 = tpu.dynamic_rotate %87 by %c32_i32_34 dim 1 : vector<1x128xf32>, i32 -> vector<1x128xf32>
    %91 = arith.mulf %88, %75 : vector<1x128xf32>
    %92 = arith.mulf %87, %89 : vector<1x128xf32>
    %93 = arith.addf %91, %92 : vector<1x128xf32>
    %94 = math.tanh %93 : vector<1x128xf32>
    %95 = arith.mulf %90, %94 : vector<1x128xf32>
    %96 = vector.extract_strided_slice %12 {offsets = [4, 0], sizes = [1, 128], strides = [1, 1]} : vector<8x128xf32> to vector<1x128xf32>
    %cst_35 = arith.constant dense<0.000000e+00> : vector<1x128xf32>
    %97 = tpu.matmul %95, %13, %cst_35 {dimension_numbers = #tpu.dot_dimension_numbers<[1], [0], [0], [1], [0, 0, 1, 1], [], []>} : vector<1x128xf32>, vector<128x128xf32>, vector<1x128xf32> -> vector<1x128xf32>
    %98 = arith.addf %96, %97 : vector<1x128xf32>
    %99 = math.tanh %98 : vector<1x128xf32>
    %100 = arith.negf %98 : vector<1x128xf32>
    %101 = math.exp %100 : vector<1x128xf32>
    %cst_36 = arith.constant 1.000000e+00 : f32
    %102 = vector.broadcast %cst_36 : f32 to vector<1x128xf32>
    %103 = arith.addf %102, %101 : vector<1x128xf32>
    %104 = arith.divf %102, %103 : vector<1x128xf32>
    %105 = arith.select %19, %99, %104 : vector<1x128xi1>, vector<1x128xf32>
    %c96_i32_37 = arith.constant 96 : i32
    %106 = tpu.dynamic_rotate %105 by %c96_i32_37 dim 1 : vector<1x128xf32>, i32 -> vector<1x128xf32>
    %c64_i32_38 = arith.constant 64 : i32
    %107 = tpu.dynamic_rotate %105 by %c64_i32_38 dim 1 : vector<1x128xf32>, i32 -> vector<1x128xf32>
    %c32_i32_39 = arith.constant 32 : i32
    %108 = tpu.dynamic_rotate %105 by %c32_i32_39 dim 1 : vector<1x128xf32>, i32 -> vector<1x128xf32>
    %109 = arith.mulf %106, %93 : vector<1x128xf32>
    %110 = arith.mulf %105, %107 : vector<1x128xf32>
    %111 = arith.addf %109, %110 : vector<1x128xf32>
    %112 = math.tanh %111 : vector<1x128xf32>
    %113 = arith.mulf %108, %112 : vector<1x128xf32>
    %114 = vector.extract_strided_slice %12 {offsets = [5, 0], sizes = [1, 128], strides = [1, 1]} : vector<8x128xf32> to vector<1x128xf32>
    %cst_40 = arith.constant dense<0.000000e+00> : vector<1x128xf32>
    %115 = tpu.matmul %113, %13, %cst_40 {dimension_numbers = #tpu.dot_dimension_numbers<[1], [0], [0], [1], [0, 0, 1, 1], [], []>} : vector<1x128xf32>, vector<128x128xf32>, vector<1x128xf32> -> vector<1x128xf32>
    %116 = arith.addf %114, %115 : vector<1x128xf32>
    %117 = math.tanh %116 : vector<1x128xf32>
    %118 = arith.negf %116 : vector<1x128xf32>
    %119 = math.exp %118 : vector<1x128xf32>
    %cst_41 = arith.constant 1.000000e+00 : f32
    %120 = vector.broadcast %cst_41 : f32 to vector<1x128xf32>
    %121 = arith.addf %120, %119 : vector<1x128xf32>
    %122 = arith.divf %120, %121 : vector<1x128xf32>
    %123 = arith.select %19, %117, %122 : vector<1x128xi1>, vector<1x128xf32>
    %c96_i32_42 = arith.constant 96 : i32
    %124 = tpu.dynamic_rotate %123 by %c96_i32_42 dim 1 : vector<1x128xf32>, i32 -> vector<1x128xf32>
    %c64_i32_43 = arith.constant 64 : i32
    %125 = tpu.dynamic_rotate %123 by %c64_i32_43 dim 1 : vector<1x128xf32>, i32 -> vector<1x128xf32>
    %c32_i32_44 = arith.constant 32 : i32
    %126 = tpu.dynamic_rotate %123 by %c32_i32_44 dim 1 : vector<1x128xf32>, i32 -> vector<1x128xf32>
    %127 = arith.mulf %124, %111 : vector<1x128xf32>
    %128 = arith.mulf %123, %125 : vector<1x128xf32>
    %129 = arith.addf %127, %128 : vector<1x128xf32>
    %130 = math.tanh %129 : vector<1x128xf32>
    %131 = arith.mulf %126, %130 : vector<1x128xf32>
    %132 = vector.extract_strided_slice %12 {offsets = [6, 0], sizes = [1, 128], strides = [1, 1]} : vector<8x128xf32> to vector<1x128xf32>
    %cst_45 = arith.constant dense<0.000000e+00> : vector<1x128xf32>
    %133 = tpu.matmul %131, %13, %cst_45 {dimension_numbers = #tpu.dot_dimension_numbers<[1], [0], [0], [1], [0, 0, 1, 1], [], []>} : vector<1x128xf32>, vector<128x128xf32>, vector<1x128xf32> -> vector<1x128xf32>
    %134 = arith.addf %132, %133 : vector<1x128xf32>
    %135 = math.tanh %134 : vector<1x128xf32>
    %136 = arith.negf %134 : vector<1x128xf32>
    %137 = math.exp %136 : vector<1x128xf32>
    %cst_46 = arith.constant 1.000000e+00 : f32
    %138 = vector.broadcast %cst_46 : f32 to vector<1x128xf32>
    %139 = arith.addf %138, %137 : vector<1x128xf32>
    %140 = arith.divf %138, %139 : vector<1x128xf32>
    %141 = arith.select %19, %135, %140 : vector<1x128xi1>, vector<1x128xf32>
    %c96_i32_47 = arith.constant 96 : i32
    %142 = tpu.dynamic_rotate %141 by %c96_i32_47 dim 1 : vector<1x128xf32>, i32 -> vector<1x128xf32>
    %c64_i32_48 = arith.constant 64 : i32
    %143 = tpu.dynamic_rotate %141 by %c64_i32_48 dim 1 : vector<1x128xf32>, i32 -> vector<1x128xf32>
    %c32_i32_49 = arith.constant 32 : i32
    %144 = tpu.dynamic_rotate %141 by %c32_i32_49 dim 1 : vector<1x128xf32>, i32 -> vector<1x128xf32>
    %145 = arith.mulf %142, %129 : vector<1x128xf32>
    %146 = arith.mulf %141, %143 : vector<1x128xf32>
    %147 = arith.addf %145, %146 : vector<1x128xf32>
    %148 = math.tanh %147 : vector<1x128xf32>
    %149 = arith.mulf %144, %148 : vector<1x128xf32>
    %150 = vector.extract_strided_slice %12 {offsets = [7, 0], sizes = [1, 128], strides = [1, 1]} : vector<8x128xf32> to vector<1x128xf32>
    %cst_50 = arith.constant dense<0.000000e+00> : vector<1x128xf32>
    %151 = tpu.matmul %149, %13, %cst_50 {dimension_numbers = #tpu.dot_dimension_numbers<[1], [0], [0], [1], [0, 0, 1, 1], [], []>} : vector<1x128xf32>, vector<128x128xf32>, vector<1x128xf32> -> vector<1x128xf32>
    %152 = arith.addf %150, %151 : vector<1x128xf32>
    %153 = math.tanh %152 : vector<1x128xf32>
    %154 = arith.negf %152 : vector<1x128xf32>
    %155 = math.exp %154 : vector<1x128xf32>
    %cst_51 = arith.constant 1.000000e+00 : f32
    %156 = vector.broadcast %cst_51 : f32 to vector<1x128xf32>
    %157 = arith.addf %156, %155 : vector<1x128xf32>
    %158 = arith.divf %156, %157 : vector<1x128xf32>
    %159 = arith.select %19, %153, %158 : vector<1x128xi1>, vector<1x128xf32>
    %c96_i32_52 = arith.constant 96 : i32
    %160 = tpu.dynamic_rotate %159 by %c96_i32_52 dim 1 : vector<1x128xf32>, i32 -> vector<1x128xf32>
    %c64_i32_53 = arith.constant 64 : i32
    %161 = tpu.dynamic_rotate %159 by %c64_i32_53 dim 1 : vector<1x128xf32>, i32 -> vector<1x128xf32>
    %c32_i32_54 = arith.constant 32 : i32
    %162 = tpu.dynamic_rotate %159 by %c32_i32_54 dim 1 : vector<1x128xf32>, i32 -> vector<1x128xf32>
    %163 = arith.mulf %160, %147 : vector<1x128xf32>
    %164 = arith.mulf %159, %161 : vector<1x128xf32>
    %165 = arith.addf %163, %164 : vector<1x128xf32>
    %166 = math.tanh %165 : vector<1x128xf32>
    %167 = arith.mulf %162, %166 : vector<1x128xf32>
    %168 = tpu.concatenate %41, %59, %77, %95, %113, %131, %149, %167 in 0 : vector<1x128xf32>, vector<1x128xf32>, vector<1x128xf32>, vector<1x128xf32>, vector<1x128xf32>, vector<1x128xf32>, vector<1x128xf32>, vector<1x128xf32> -> vector<8x128xf32>
    %cst_55 = arith.constant 0.000000e+00 : f32
    %169 = vector.shape_cast %21 : vector<1x128xi1> to vector<1x128xi1>
    %170 = vector.broadcast %169 : vector<1x128xi1> to vector<8x128xi1>
    %171 = vector.broadcast %cst_55 : f32 to vector<8x128xf32>
    %172 = arith.select %170, %168, %171 : vector<8x128xi1>, vector<8x128xf32>
    %cst_56 = arith.constant dense<0.000000e+00> : vector<8xf32>
    %173 = vector.multi_reduction <add>, %172, %cst_56 [1] : vector<8x128xf32> to vector<8xf32>
    %174 = vector.shape_cast %173 : vector<8xf32> to vector<8x1xf32>
    %cst_57 = arith.constant 3.125000e-02 : f32
    %175 = vector.broadcast %cst_57 : f32 to vector<8x1xf32>
    %176 = arith.mulf %174, %175 : vector<8x1xf32>
    %177 = vector.broadcast %176 : vector<8x1xf32> to vector<8x128xf32>
    %178 = arith.subf %168, %177 : vector<8x128xf32>
    %179 = arith.mulf %178, %178 : vector<8x128xf32>
    %cst_58 = arith.constant 0.000000e+00 : f32
    %180 = vector.shape_cast %21 : vector<1x128xi1> to vector<1x128xi1>
    %181 = vector.broadcast %180 : vector<1x128xi1> to vector<8x128xi1>
    %182 = vector.broadcast %cst_58 : f32 to vector<8x128xf32>
    %183 = arith.select %181, %179, %182 : vector<8x128xi1>, vector<8x128xf32>
    %cst_59 = arith.constant dense<0.000000e+00> : vector<8xf32>
    %184 = vector.multi_reduction <add>, %183, %cst_59 [1] : vector<8x128xf32> to vector<8xf32>
    %185 = vector.shape_cast %184 : vector<8xf32> to vector<8x1xf32>
    %cst_60 = arith.constant 3.125000e-02 : f32
    %186 = vector.broadcast %cst_60 : f32 to vector<8x1xf32>
    %187 = arith.mulf %185, %186 : vector<8x1xf32>
    %cst_61 = arith.constant 9.99999974E-6 : f32
    %188 = vector.broadcast %cst_61 : f32 to vector<8x1xf32>
    %189 = arith.addf %187, %188 : vector<8x1xf32>
    %190 = math.rsqrt %189 : vector<8x1xf32>
    %191 = vector.broadcast %190 : vector<8x1xf32> to vector<8x128xf32>
    %192 = arith.mulf %178, %191 : vector<8x128xf32>
    %c0_62 = arith.constant 0 : index
    %c0_63 = arith.constant 0 : index
    %193 = vector.load %arg5[%c0_62, %c0_63] : memref<128x128xf32, #tpu.memory_space<vmem>>, vector<128x128xf32>
    %cst_64 = arith.constant dense<0.000000e+00> : vector<8x128xf32>
    %194 = tpu.matmul %192, %193, %cst_64 {dimension_numbers = #tpu.dot_dimension_numbers<[1], [0], [0], [1], [0, 0, 1, 1], [], []>} : vector<8x128xf32>, vector<128x128xf32>, vector<8x128xf32> -> vector<8x128xf32>
    %c1 = arith.constant 1 : index
    %c0_65 = arith.constant 0 : index
    %195 = vector.load %arg6[%c1, %c0_65] : memref<4x128xf32, #tpu.memory_space<vmem>>, vector<1x128xf32>
    %196 = vector.broadcast %195 : vector<1x128xf32> to vector<8x128xf32>
    %197 = arith.addf %194, %196 : vector<8x128xf32>
    %c0_66 = arith.constant 0 : index
    %c0_67 = arith.constant 0 : index
    %198 = vector.load %arg7[%c0_66, %c0_67] : memref<8x128xf32, #tpu.memory_space<vmem>>, vector<8x128xf32>
    tpu.vector_store %arg7[%c0_66, %c0_67], %197 {strides = array<i32>} : memref<8x128xf32, #tpu.memory_space<vmem>>, vector<8x128xf32>,
    %199 = tpu.concatenate %167, %165 in 0 : vector<1x128xf32>, vector<1x128xf32> -> vector<2x128xf32>
    %c0_68 = arith.constant 0 : index
    %c0_69 = arith.constant 0 : index
    %200 = vector.load %arg8[%c0_68, %c0_69] : memref<2x128xf32, #tpu.memory_space<vmem>>, vector<2x128xf32>
    tpu.vector_store %arg8[%c0_68, %c0_69], %199 {strides = array<i32>} : memref<2x128xf32, #tpu.memory_space<vmem>>, vector<2x128xf32>,
    return
  }
}

</mosaic_0001>

<bundles_post_ra>
// kernel: tpu_custom_call.1
= control target key start
LH: loop header
LB: loop body
LE: loop exit
PB: predicated region body
PF: predicated region fallthrough
CT: control target
= control target key end

     0   :  { %14 = vsyncpa [#allocation3], 0  ;;  %s2805_s0 = inlined_call_operand.hbm [shape: f32[8,150], index: 0, kind: input, shape index: {}]   ;;  %s2806_s1 = inlined_call_operand.hbm [shape: f32[150,256], index: 1, kind: input, shape index: {}]   ;;  %s2807_s2 = inlined_call_operand.vmem [shape: f32[1,256], index: 2, kind: input, shape index: {}]   ;;  %s2808_s3 = inlined_call_operand.hbm [shape: f32[256,128], index: 3, kind: input, shape index: {}]   ;;  %s2809_s4 = inlined_call_operand.hbm [shape: f32[128,128], index: 4, kind: input, shape index: {}]   ;;  %s2810_s5 = inlined_call_operand.hbm [shape: f32[128,128], index: 5, kind: input, shape index: {}]   ;;  %s2811_s6 = inlined_call_operand.vmem [shape: f32[4,128], index: 6, kind: input, shape index: {}]   ;;  %s2812_s7 = inlined_call_operand.hbm [shape: f32[8,128], index: 7, kind: output, shape index: {0}]   ;;  %s2813_s8 = inlined_call_operand.hbm [shape: f32[2,128], index: 8, kind: output, shape index: {1}]  }
   0x1   :  { %15 = vsyncpa [#allocation6], 0 }
   0x2   :  { %16 = vsyncpa [#allocation9], 0 }
   0x3   :  { %17 = vsyncpa [#allocation4], 0 }
   0x4   :  { %18 = vsyncpa [#allocation13], 0  ;;  %s2391_s27 = smov [#allocation5]   ;;  %s2227_s9 = scalar_lea.hbm %s2806_s1, 4864 }
   0x5   :  { %s34_s28 = sshll.u32 %s2391_s27, 4  ;;  %p2228_p0 = scmp.ne.s32.totalorder %s2806_s1, %s2227_s9  ;;  %s35_s28 = int_to_ptr.vmem [resolvable:$true] %s34_s28 }
   0x6   :  { %p2231_p1 = scmp.lt.u32.totalorder %s2227_s9, %s2806_s1 }
   0x8   :  { %p2233_p2 = pnand %p2231_p1, %p2228_p0 }
   0xa   :  { %2236 = shalt.err (!%p2233_p2)
}
   0xb   :  { %s2237_s14 = scalar_lea.vmem %s35_s28, 4864  ;;  %p2242_p4 = scmp.lt.s32.totalorder %s35_s28, %s35_s28 }
   0xc   :  { %p2238_p3 = scmp.ne.s32.totalorder %s35_s28, %s2237_s14  ;;  %p2243_p5 = scmp.lt.s32.totalorder %s2237_s14, %s2237_s14 }
   0xe   :  { %p2244_p6 = por %p2243_p5, %p2242_p4 }
  0x10   :  { %p2245_p7 = pnand %p2244_p6, %p2238_p3 }
  0x12   :  { %2248 = shalt.err (!%p2245_p7)
}
  0x13   :  { %s2392_s15 = smov 256   ;;  %s2393_s16 = smov 16  }
  0x14   :  { %40 = dma.hbm_to_vmem [thread:$0]  %s2806_s1, 4864, %s35_s28, [#allocation6], %s2392_s15, %s2392_s15, %s2393_s16  }
  0x15   :  { %s2394_s19 = smov [#allocation8]   ;;  %s2395_s21 = smov [#allocation2]  }
  0x16   :  { %s60_s20 = sshll.u32 %s2394_s19, 4  ;;  %s25_s22 = sshll.u32 %s2395_s21, 4  ;;  %s61_s20 = int_to_ptr.vmem [resolvable:$true] %s60_s20  ;;  %s26_s22 = int_to_ptr.vmem [resolvable:$true] %s25_s22 }
  0x17   :  { %s2249_s25 = scalar_lea.hbm %s2809_s4, 2048 }
  0x18   :  { %p2250_p8 = scmp.ne.s32.totalorder %s2809_s4, %s2249_s25  ;;  %p2253_p9 = scmp.lt.u32.totalorder %s2249_s25, %s2809_s4 }
  0x1a   :  { %p2255_p10 = pnand %p2253_p9, %p2250_p8 }
  0x1c   :  { %2258 = shalt.err (!%p2255_p10)
}
  0x1d   :  { %s2259_s1 = scalar_lea.vmem %s61_s20, 2048  ;;  %p2264_p12 = scmp.lt.s32.totalorder %s61_s20, %s61_s20 }
  0x1e   :  { %p2260_p11 = scmp.ne.s32.totalorder %s61_s20, %s2259_s1  ;;  %p2265_p13 = scmp.lt.s32.totalorder %s2259_s1, %s2259_s1 }
  0x20   :  { %p2266_p0 = por %p2265_p13, %p2264_p12 }
  0x22   :  { %p2267_p1 = pnand %p2266_p0, %p2260_p11 }
  0x24   :  { %2270 = shalt.err (!%p2267_p1)
}
  0x25   :  { %s2396_s28 = smov 128   ;;  %s2397_s9 = smov 8  }
  0x26   :  { %66 = dma.hbm_to_vmem [thread:$0]  %s2809_s4, 2048, %s61_s20, [#allocation9], %s2396_s28, %s2396_s28, %s2397_s9  }
  0x27   :  { %s2271_s14 = scalar_lea.hbm %s2805_s0, 256 }
  0x28   :  { %p2272_p2 = scmp.ne.s32.totalorder %s2805_s0, %s2271_s14  ;;  %p2275_p3 = scmp.lt.u32.totalorder %s2271_s14, %s2805_s0 }
  0x2a   :  { %p2277_p4 = pnand %p2275_p3, %p2272_p2 }
  0x2c   :  { %2280 = shalt.err (!%p2277_p4)
}
  0x2d   :  { %s2281_s19 = scalar_lea.vmem %s26_s22, 256  ;;  %p2286_p6 = scmp.lt.s32.totalorder %s26_s22, %s26_s22 }
  0x2e   :  { %p2282_p5 = scmp.ne.s32.totalorder %s26_s22, %s2281_s19  ;;  %p2287_p7 = scmp.lt.s32.totalorder %s2281_s19, %s2281_s19 }
  0x30   :  { %p2288_p8 = por %p2287_p7, %p2286_p6 }
  0x32   :  { %p2289_p9 = pnand %p2288_p8, %p2282_p5 }
  0x34   :  { %2292 = shalt.err (!%p2289_p9)
}
  0x35   :  { %28 = dma.hbm_to_vmem [thread:$0]  %s2805_s0, 256, %s26_s22, [#allocation3]  }
  0x36   :  { %s2398_s21 = smov [#allocation7]   ;;  %s2399_s24 = smov [#allocation10]  }
  0x37   :  { %s48_s23 = sshll.u32 %s2398_s21, 4  ;;  %s72_s25 = sshll.u32 %s2399_s24, 4  ;;  %s49_s23 = int_to_ptr.vmem [resolvable:$true] %s48_s23  ;;  %s73_s25 = int_to_ptr.vmem [resolvable:$true] %s72_s25 }
  0x38   :  { %s2293_s29 = scalar_lea.hbm %s2808_s3, 4096 }
  0x39   :  { %p2294_p10 = scmp.ne.s32.totalorder %s2808_s3, %s2293_s29  ;;  %p2297_p11 = scmp.lt.u32.totalorder %s2293_s29, %s2808_s3 }
  0x3b   :  { %p2299_p12 = pnand %p2297_p11, %p2294_p10 }
  0x3d   :  { %2302 = shalt.err (!%p2299_p12)
}
  0x3e   :  { %s2303_s0 = scalar_lea.vmem %s49_s23, 4096  ;;  %p2308_p0 = scmp.lt.s32.totalorder %s49_s23, %s49_s23 }
  0x3f   :  { %p2304_p13 = scmp.ne.s32.totalorder %s49_s23, %s2303_s0  ;;  %p2309_p1 = scmp.lt.s32.totalorder %s2303_s0, %s2303_s0 }
  0x41   :  { %p2310_p2 = por %p2309_p1, %p2308_p0 }
  0x43   :  { %p2311_p3 = pnand %p2310_p2, %p2304_p13 }
  0x45   :  { %2314 = shalt.err (!%p2311_p3)
}
  0x46   :  { %54 = dma.hbm_to_vmem [thread:$0]  %s2808_s3, 4096, %s49_s23, [#allocation6], %s2396_s28, %s2396_s28, %s2397_s9  }
  0x47   :  { %s2315_s15 = scalar_lea.hbm %s2810_s5, 2048 }
  0x48   :  { %p2316_p4 = scmp.ne.s32.totalorder %s2810_s5, %s2315_s15  ;;  %p2319_p5 = scmp.lt.u32.totalorder %s2315_s15, %s2810_s5 }
  0x4a   :  { %p2321_p6 = pnand %p2319_p5, %p2316_p4 }
  0x4c   :  { %2324 = shalt.err (!%p2321_p6)
}
  0x4d   :  { %s2325_s4 = scalar_lea.vmem %s73_s25, 2048  ;;  %p2330_p8 = scmp.lt.s32.totalorder %s73_s25, %s73_s25 }
  0x4e   :  { %p2326_p7 = scmp.ne.s32.totalorder %s73_s25, %s2325_s4  ;;  %p2331_p9 = scmp.lt.s32.totalorder %s2325_s4, %s2325_s4 }
  0x50   :  { %p2332_p10 = por %p2331_p9, %p2330_p8 }
  0x52   :  { %p2333_p11 = pnand %p2332_p10, %p2326_p7 }
  0x54   :  { %2336 = shalt.err (!%p2333_p11)
}
  0x55   :  { %78 = dma.hbm_to_vmem [thread:$0]  %s2810_s5, 2048, %s73_s25, [#allocation9], %s2396_s28, %s2396_s28, %s2397_s9  }
  0x56   :  { %2381 = dma.done.wait [#allocation3], 256  }
  0x57   :  { %2382 = vsyncadd [#allocation3], 4294967040 }
  0x58   :  { %2383 = dma.done.wait [#allocation6], 8960  }
  0x59   :  { %2384 = vsyncadd [#allocation6], 4294958336 }
  0x5a   :  { %2385 = dma.done.wait [#allocation9], 4096  }
  0x5b   :  { %2386 = vsyncadd [#allocation9], 4294963200  ;;  %v99_v0 = vld [vmem:[#allocation5 + $0x8] sm:$0xff]  ;;  %v101_v1 = vld [vmem:[#allocation5 + $0x18] sm:$0xff]  ;;  %vm148_vm0 = vcmask 179200   ;;  %vm152_vm1 = vcmask 1045504  }
  0x5c   :  { %v98_v2 = vld [vmem:[#allocation5] sm:$0xff]  ;;  %v1860_v3 = vpack.c.bf16 %v101_v1, %v99_v0  ;;  %v100_v4 = vld [vmem:[#allocation5 + $0x10] sm:$0xff]  ;;  %v103_v5 = vld [vmem:[#allocation5 + $0x28] sm:$0xff]  ;;  %vm2401_vm2 = vmmov 0   ;;  %s2403_s24 = smov 32   ;;  %s2404_s25 = smov 96  }
  0x5d   :  { %v105_v6 = vld [vmem:[#allocation5 + $0x38] sm:$0xff]  ;;  %v1862_v7 = vpack.c.bf16 %v100_v4, %v98_v2  ;;  %v102_v9 = vld [vmem:[#allocation5 + $0x20] sm:$0xff]  ;;  %v104_v10 = vld [vmem:[#allocation5 + $0x30] sm:$0xff]  ;;  %s2405_s26 = smov 64   ;;  %vm1188_vm6 = vcmask 1040384   ;;  %vm1190_vm7 = vcmask 1041408  }
  0x5e   :  { %v1864_v8 = vpack.c.bf16 %v105_v6, %v103_v5  ;;  %v107_v11 = vld [vmem:[#allocation5 + $0x48] sm:$0xff]  ;;  %1861 = vmatprep.subr.bf16.mxu0 %v1860_v3  ;;  %v109_v12 = vld [vmem:[#allocation5 + $0x58] sm:$0xff]  ;;  %v1866_v13 = vpack.c.bf16 %v104_v10, %v102_v9  ;;  %v106_v15 = vld [vmem:[#allocation5 + $0x40] sm:$0xff]  ;;  %vm1192_vm8 = vcmask 1042432   ;;  %vm1194_vm9 = vcmask 1043456   ;;  %s2406_s30 = smov [#allocation12]  }
  0x5f   :  { %1863 = vmatpush1.bf16.msra.mxu0 %v1862_v7  ;;  %v1868_v14 = vpack.c.bf16 %v109_v12, %v107_v11  ;;  %v108_v16 = vld [vmem:[#allocation5 + $0x50] sm:$0xff]  ;;  %v111_v17 = vld [vmem:[#allocation5 + $0x68] sm:$0xff]  ;;  %v113_v18 = vld [vmem:[#allocation5 + $0x78] sm:$0xff]  ;;  %vm1196_vm10 = vcmask 1044480   ;;  %vm1199_vm11 = vcmask 1046528   ;;  %s1329_s1 = sshll.u32 %s2406_s30, 4  ;;  %s1330_s1 = int_to_ptr.vmem [resolvable:$true] %s1329_s1 }
  0x60   :  { %1865 = vmatprep.subr.bf16.mxu0 %v1864_v8  ;;  %v1870_v19 = vpack.c.bf16 %v108_v16, %v106_v15  ;;  %v1872_v20 = vpack.c.bf16 %v113_v18, %v111_v17  ;;  %v110_v21 = vld [vmem:[#allocation5 + $0x60] sm:$0xff]  ;;  %v112_v22 = vld [vmem:[#allocation5 + $0x70] sm:$0xff]  ;;  %v115_v23 = vld [vmem:[#allocation5 + $0x88] sm:$0xff]  ;;  %s2337_s10 = scalar_lea.vmem %s1330_s1, 32  ;;  %p2342_p13 = scmp.lt.s32.totalorder %s1330_s1, %s1330_s1 }
  0x61   :  { %v117_v24 = vld [vmem:[#allocation5 + $0x98] sm:$0xff]  ;;  %v114_v25 = vld [vmem:[#allocation5 + $0x80] sm:$0xff]  ;;  %v1874_v26 = vpack.c.bf16 %v112_v22, %v110_v21  ;;  %v116_v27 = vld [vmem:[#allocation5 + $0x90] sm:$0xff]  ;;  %p2338_p12 = scmp.ne.s32.totalorder %s1330_s1, %s2337_s10  ;;  %p2343_p0 = scmp.lt.s32.totalorder %s2337_s10, %s2337_s10 }
  0x62   :  { %v119_v28 = vld [vmem:[#allocation5 + $0xa8] sm:$0xff]  ;;  %v97_v29 = vld [vmem:[#allocation2 + $0x8] sm:$0xff]  ;;  %v1876_v30 = vpack.c.bf16 %v117_v24, %v115_v23  ;;  %v248_v32 = vld [vmem:[#allocation7 + $0x80] sm:$0xff]  ;;  %v1878_v42 = vpack.c.bf16 %v116_v27, %v114_v25 }
  0x63   :  { %1867 = vmatpush1.bf16.msra.mxu0 %v1866_v13  ;;  %v121_v31 = vld [vmem:[#allocation5 + $0xb8] sm:$0xff]  ;;  %1346 = vmatprep.mubr.msk.f32.mxu0 %vm148_vm0, %v97_v29  ;;  %v232_v35 = vld [vmem:[#allocation7] sm:$0xff]  ;;  %v250_v37 = vld [vmem:[#allocation7 + $0x90] sm:$0xff]  ;;  %p2344_p1 = por %p2343_p0, %p2342_p13 }
  0x64   :  { %1869 = vmatprep.subr.bf16.mxu0 %v1868_v14  ;;  %v249_v33 = vld [vmem:[#allocation7 + $0x88] sm:$0xff]  ;;  %v251_v39 = vld [vmem:[#allocation7 + $0x98] sm:$0xff]  ;;  %v234_v40 = vld [vmem:[#allocation7 + $0x10] sm:$0xff]  ;;  %v1880_v46 = vpack.c.bf16 %v121_v31, %v119_v28 }
  0x65   :  { %v1896_v34 = vpack.c.bf16 %v249_v33, %v248_v32  ;;  %v233_v36 = vld [vmem:[#allocation7 + $0x8] sm:$0xff]  ;;  %v235_v41 = vld [vmem:[#allocation7 + $0x18] sm:$0xff]  ;;  %v1900_v43 = vpack.c.bf16 %v251_v39, %v250_v37  ;;  %v252_v44 = vld [vmem:[#allocation7 + $0xa0] sm:$0xff]  ;;  %p2345_p2 = pnand %p2344_p1, %p2338_p12 }
  0x66   :  { %v1898_v38 = vpack.c.bf16 %v233_v36, %v232_v35  ;;  %v253_v45 = vld [vmem:[#allocation7 + $0xa8] sm:$0xff]  ;;  %v118_v47 = vld [vmem:[#allocation5 + $0xa0] sm:$0xff]  ;;  %v120_v48 = vld [vmem:[#allocation5 + $0xb0] sm:$0xff]  ;;  %v1902_v50 = vpack.c.bf16 %v235_v41, %v234_v40 }
  0x67   :  { %1871 = vmatpush1.bf16.msra.mxu0 %v1870_v19  ;;  %1897 = vmatprep.subr.bf16.mxu1 %v1896_v34  ;;  %v123_v49 = vld [vmem:[#allocation5 + $0xc8] sm:$0xff]  ;;  %v125_v51 = vld [vmem:[#allocation5 + $0xd8] sm:$0xff]  ;;  %v1904_v52 = vpack.c.bf16 %v253_v45, %v252_v44  ;;  %v236_v53 = vld [vmem:[#allocation7 + $0x20] sm:$0xff]  ;;  %v1882_v57 = vpack.c.bf16 %v120_v48, %v118_v47  ;;  %v2400_v45 = vmov 0.0|0.0  }
  0x68   :  { %1873 = vmatprep.subr.bf16.mxu0 %v1872_v20  ;;  %1899 = vmatpush3.bf16.msra.mxu1 %v1898_v38  ;;  %v237_v54 = vld [vmem:[#allocation7 + $0x28] sm:$0xff]  ;;  %v254_v55 = vld [vmem:[#allocation7 + $0xb0] sm:$0xff]  ;;  %v255_v56 = vld [vmem:[#allocation7 + $0xb8] sm:$0xff]  ;;  %v1884_v58 = vpack.c.bf16 %v125_v51, %v123_v49 }
  0x69   :  { %1901 = vmatprep.subr.bf16.mxu1 %v1900_v43  ;;  %v122_v59 = vld [vmem:[#allocation5 + $0xc0] sm:$0xff]  ;;  %v124_v60 = vld [vmem:[#allocation5 + $0xd0] sm:$0xff]  ;;  %v127_v61 = vld [vmem:[#allocation5 + $0xe8] sm:$0xff]  ;;  %v1906_v62 = vpack.c.bf16 %v237_v54, %v236_v53  ;;  %v1908_v0 = vpack.c.bf16 %v255_v56, %v254_v55 }
  0x6a   :  { %v129_v63 = vld [vmem:[#allocation5 + $0xf8] sm:$0xff]  ;;  %v238_v1 = vld [vmem:[#allocation7 + $0x30] sm:$0xff]  ;;  %v239_v2 = vld [vmem:[#allocation7 + $0x38] sm:$0xff]  ;;  %v1886_v5 = vpack.c.bf16 %v124_v60, %v122_v59 }
  0x6b   :  { %1875 = vmatpush1.bf16.msra.mxu0 %v1874_v26  ;;  %v256_v3 = vld [vmem:[#allocation7 + $0xc0] sm:$0xff]  ;;  %v257_v4 = vld [vmem:[#allocation7 + $0xc8] sm:$0xff]  ;;  %v1888_v6 = vpack.c.bf16 %v129_v63, %v127_v61  ;;  %v126_v7 = vld [vmem:[#allocation5 + $0xe0] sm:$0xff]  ;;  %v1910_v10 = vpack.c.bf16 %v239_v2, %v238_v1 }
  0x6c   :  { %1877 = vmatprep.subr.bf16.mxu0 %v1876_v30  ;;  %1903 = vmatpush3.bf16.msra.mxu1 %v1902_v50  ;;  %v128_v8 = vld [vmem:[#allocation5 + $0xf0] sm:$0xff]  ;;  %v131_v9 = vld [vmem:[#allocation5 + $0x108] sm:$0xff]  ;;  %v133_v11 = vld [vmem:[#allocation5 + $0x118] sm:$0xff]  ;;  %v1912_v12 = vpack.c.bf16 %v257_v4, %v256_v3  ;;  %v2402_v3 = vmov 0.0   ;;  %v138_v4 = vlaneseq }
  0x6d   :  { %1905 = vmatprep.subr.bf16.mxu1 %v1904_v52  ;;  %v240_v13 = vld [vmem:[#allocation7 + $0x40] sm:$0xff]  ;;  %v241_v14 = vld [vmem:[#allocation7 + $0x48] sm:$0xff]  ;;  %v258_v15 = vld [vmem:[#allocation7 + $0xd0] sm:$0xff]  ;;  %v1890_v17 = vpack.c.bf16 %v128_v8, %v126_v7  ;;  %v1892_v18 = vpack.c.bf16 %v133_v11, %v131_v9 }
  0x6e   :  { %v259_v16 = vld [vmem:[#allocation7 + $0xd8] sm:$0xff]  ;;  %v130_v19 = vld [vmem:[#allocation5 + $0x100] sm:$0xff]  ;;  %v132_v20 = vld [vmem:[#allocation5 + $0x110] sm:$0xff]  ;;  %v1914_v21 = vpack.c.bf16 %v241_v14, %v240_v13 }
  0x6f   :  { %1879 = vmatpush1.bf16.msra.mxu0 %v1878_v42  ;;  %v1916_v22 = vpack.c.bf16 %v259_v16, %v258_v15  ;;  %v242_v23 = vld [vmem:[#allocation7 + $0x50] sm:$0xff]  ;;  %v243_v24 = vld [vmem:[#allocation7 + $0x58] sm:$0xff]  ;;  %v260_v25 = vld [vmem:[#allocation7 + $0xe0] sm:$0xff]  ;;  %v1894_v27 = vpack.c.bf16 %v132_v20, %v130_v19 }
  0x70   :  { %1881 = vmatprep.subr.bf16.mxu0 %v1880_v46  ;;  %1907 = vmatpush3.bf16.msra.mxu1 %v1906_v62  ;;  %v261_v26 = vld [vmem:[#allocation7 + $0xe8] sm:$0xff]  ;;  %v1918_v28 = vpack.c.bf16 %v243_v24, %v242_v23  ;;  %v135_v29 = vld [vmem:[#allocation5 + $0x128] sm:$0x3f]  ;;  %v244_v31 = vld [vmem:[#allocation7 + $0x60] sm:$0xff] }
  0x71   :  { %1909 = vmatprep.subr.bf16.mxu1 %v1908_v0  ;;  %v1920_v30 = vpack.c.bf16 %v261_v26, %v260_v25  ;;  %v245_v32 = vld [vmem:[#allocation7 + $0x68] sm:$0xff]  ;;  %v134_v33 = vld [vmem:[#allocation5 + $0x120] sm:$0x3f]  ;;  %v96_v35 = vld [vmem:[#allocation2] sm:$0xff] }
  0x72   :  { %v1922_v34 = vpack.c.bf16 %v245_v32, %v244_v31  ;;  %v262_v36 = vld [vmem:[#allocation7 + $0xf0] sm:$0xff]  ;;  %v263_v37 = vld [vmem:[#allocation7 + $0xf8] sm:$0xff]  ;;  %v339_v42 = vld [vmem:[#allocation8] sm:$0xff] }
  0x73   :  { %1883 = vmatpush1.bf16.msra.mxu0 %v1882_v57  ;;  %v1924_v38 = vpack.c.bf16 %v263_v37, %v262_v36  ;;  %v246_v39 = vld [vmem:[#allocation7 + $0x70] sm:$0xff]  ;;  %v247_v40 = vld [vmem:[#allocation7 + $0x78] sm:$0xff]  ;;  %v340_v43 = vld [vmem:[#allocation8 + $0x8] sm:$0xff] }
  0x74   :  { %1885 = vmatprep.subr.bf16.mxu0 %v1884_v58  ;;  %1911 = vmatpush3.bf16.msra.mxu1 %v1910_v10  ;;  %v1926_v41 = vpack.c.bf16 %v247_v40, %v246_v39  ;;  %v2524_v44 = vpack.c.bf16 %v340_v43, %v339_v42  ;;  %v341_v46 = vld [vmem:[#allocation8 + $0x10] sm:$0xff]  ;;  %v342_v47 = vld [vmem:[#allocation8 + $0x18] sm:$0xff]  ;;  %v343_v49 = vld [vmem:[#allocation8 + $0x20] sm:$0xff] }
  0x75   :  { %1913 = vmatprep.subr.bf16.mxu1 %v1912_v12  ;;  %v2530_v48 = vpack.c.bf16 %v342_v47, %v341_v46  ;;  %v344_v50 = vld [vmem:[#allocation8 + $0x28] sm:$0xff]  ;;  %v345_v52 = vld [vmem:[#allocation8 + $0x30] sm:$0xff]  ;;  %v346_v53 = vld [vmem:[#allocation8 + $0x38] sm:$0xff] }
  0x76   :  { %v2534_v51 = vpack.c.bf16 %v344_v50, %v343_v49  ;;  %v2538_v54 = vpack.c.bf16 %v346_v53, %v345_v52  ;;  %v347_v55 = vld [vmem:[#allocation8 + $0x40] sm:$0xff]  ;;  %v348_v56 = vld [vmem:[#allocation8 + $0x48] sm:$0xff]  ;;  %v349_v58 = vld [vmem:[#allocation8 + $0x50] sm:$0xff] }
  0x77   :  { %1887 = vmatpush1.bf16.msra.mxu0 %v1886_v5  ;;  %v2542_v57 = vpack.c.bf16 %v348_v56, %v347_v55  ;;  %v350_v59 = vld [vmem:[#allocation8 + $0x58] sm:$0xff]  ;;  %v351_v61 = vld [vmem:[#allocation8 + $0x60] sm:$0xff]  ;;  %v352_v62 = vld [vmem:[#allocation8 + $0x68] sm:$0xff]  ;;  %v139_v5 = vshrl.u32 %v138_v4, 7 }
  0x78   :  { %1889 = vmatprep.subr.bf16.mxu0 %v1888_v6  ;;  %1915 = vmatpush3.bf16.msra.mxu1 %v1914_v21  ;;  %v2546_v60 = vpack.c.bf16 %v350_v59, %v349_v58  ;;  %v2550_v63 = vpack.c.bf16 %v352_v62, %v351_v61  ;;  %v353_v0 = vld [vmem:[#allocation8 + $0x70] sm:$0xff]  ;;  %v354_v1 = vld [vmem:[#allocation8 + $0x78] sm:$0xff]  ;;  %v136_v7 = vld [vmem:[%s2807_s2] sm:$0x3] }
  0x79   :  { %1917 = vmatprep.subr.bf16.mxu1 %v1916_v22  ;;  %v2554_v2 = vpack.c.bf16 %v354_v1, %v353_v0  ;;  %v140_v6 = vsub.s32 0, %v139_v5  ;;  %v144_v8 = vsub.s32 1, %v139_v5  ;;  %v1347_v21 = vld [vmem:[%s2811_s6] ss:$0 sm:$0xff] }
  0x7b   :  { %1891 = vmatpush1.bf16.msra.mxu0 %v1890_v17  ;;  %v141_v9 = vrot.slane %v136_v7, %v140_v6  ;;  %v145_v10 = vrot.slane %v136_v7, %v144_v8  ;;  %v361_v17 = vld [vmem:[%s2811_s6 + $0x2] sm:$0x1] }
  0x7c   :  { %1893 = vmatprep.subr.bf16.mxu0 %v1892_v18  ;;  %1919 = vmatpush3.bf16.msra.mxu1 %v1918_v28 }
  0x7d   :  { %1921 = vmatprep.subr.bf16.mxu1 %v1920_v30 }
  0x7f   :  { %1895 = vmatpush1.bf16.msra.mxu0 %v1894_v27 }
  0x80   :  { %1344 = vmatprep.subr.msk.mxu0 %vm152_vm1, %v135_v29  ;;  %1923 = vmatpush3.bf16.msra.mxu1 %v1922_v34  ;;  %v2610_v29 = vand.u32 127, %v138_v4 }
  0x81   :  { %1925 = vmatprep.subr.bf16.mxu1 %v1924_v38 }
  0x82   :  { %vm357_vm3 = vcmp.ge.s32.totalorder %v2610_v29, 64  ;;  %vm358_vm4 = vcmp.lt.s32.totalorder %v2610_v29, 96  ;;  %vm360_vm12 = vcmp.lt.s32.totalorder %v2610_v29, 32 }
  0x83   :  { %1345 = vmatpush1.msk.msra.mxu0 %vm152_vm1, %v134_v33  ;;  %vm2614_vm5 = vmand %vm357_vm3, %vm358_vm4 }
  0x84   :  { %224 = vmatmul.mubr.f32.vlgmr.msra.gmra.mrb[0].mxu0 %v96_v35  ;;  %1927 = vmatpush3.bf16.msra.mxu1 %v1926_v41  ;;  %v362_v35 = vld [vmem:[%s2811_s6 + $0x3] sm:$0x1] }
  0x85   :  { %1928 = vmatprep.subr.bf16.mxu1 %v2400_v45  ;;  %1952 = vmatprep.subr.bf16.mxu0 %v2400_v45 }
  0x86   :  { %1954 = vmatpush3.bf16.msra.mxu0 %v2524_v44  ;;  %1612 = vmatprep.mubr.msk.f32.mxu0 %vm2401_vm2, %v2402_v3 }
  0x87   :  { %1955 = vmatprep.subr.bf16.mxu0 %v2400_v45 }
  0x8a   :  { %1957 = vmatpush3.bf16.msra.mxu0 %v2530_v48 }
  0x8b   :  { %1958 = vmatprep.subr.bf16.mxu0 %v2400_v45 }
  0x8e   :  { %1960 = vmatpush3.bf16.msra.mxu0 %v2534_v51 }
  0x8f   :  { %1961 = vmatprep.subr.bf16.mxu0 %v2400_v45 }
  0x92   :  { %1963 = vmatpush3.bf16.msra.mxu0 %v2538_v54 }
  0x93   :  { %1964 = vmatprep.subr.bf16.mxu0 %v2400_v45 }
  0x96   :  { %1966 = vmatpush3.bf16.msra.mxu0 %v2542_v57 }
  0x97   :  { %1967 = vmatprep.subr.bf16.mxu0 %v2400_v45 }
  0x9a   :  { %1969 = vmatpush3.bf16.msra.mxu0 %v2546_v60 }
  0x9b   :  { %1970 = vmatprep.subr.bf16.mxu0 %v2400_v45 }
  0x9e   :  { %1972 = vmatpush3.bf16.msra.mxu0 %v2550_v63 }
  0x9f   :  { %1973 = vmatprep.subr.bf16.mxu0 %v2400_v45 }
  0xa2   :  { %1975 = vmatpush3.bf16.msra.mxu0 %v2554_v2 }
  0xa3   :  { %2000 = vmatprep.subr.bf16.mxu0 %v2400_v45 }
 0x157   :  { %v225_v11 = vpop.f32.mrb[0].mxu0 }
 0x158   :  { %v226_v12 = vadd.f32 %v225_v11, %v141_v9  ;;  %v227_v13 = vpop.f32.mrb[1].mxu0 }
 0x159   :  { %v228_v14 = vadd.f32 %v227_v13, %v145_v10 }
 0x15a   :  { %v230_v16 = vmax.f32 %v226_v12, 0.0 }
 0x15b   :  { %v231_v15 = vmax.f32 %v228_v14, 0.0 }
 0x15d   :  { %333 = vmatprep.mubr.f32.mxu1 %v231_v15 }
 0x15e   :  { %334 = vmatmul.mubr.f32.vlgmr.msra.gmra.mrb[0].mxu1 %v230_v16 }
 0x15f   :  { %1930 = vmatpush3.bf16.msra.mxu1 %v2524_v44  ;;  %1577 = vmatprep.mubr.msk.f32.mxu1 %vm2401_vm2, %v2402_v3 }
 0x160   :  { %1931 = vmatprep.subr.bf16.mxu1 %v2400_v45 }
 0x163   :  { %1933 = vmatpush3.bf16.msra.mxu1 %v2530_v48 }
 0x164   :  { %1934 = vmatprep.subr.bf16.mxu1 %v2400_v45 }
 0x167   :  { %1936 = vmatpush3.bf16.msra.mxu1 %v2534_v51 }
 0x168   :  { %1937 = vmatprep.subr.bf16.mxu1 %v2400_v45 }
 0x16b   :  { %1939 = vmatpush3.bf16.msra.mxu1 %v2538_v54 }
 0x16c   :  { %1940 = vmatprep.subr.bf16.mxu1 %v2400_v45 }
 0x16f   :  { %1942 = vmatpush3.bf16.msra.mxu1 %v2542_v57 }
 0x170   :  { %1943 = vmatprep.subr.bf16.mxu1 %v2400_v45 }
 0x173   :  { %1945 = vmatpush3.bf16.msra.mxu1 %v2546_v60 }
 0x174   :  { %1946 = vmatprep.subr.bf16.mxu1 %v2400_v45 }
 0x177   :  { %1948 = vmatpush3.bf16.msra.mxu1 %v2550_v63 }
 0x178   :  { %1949 = vmatprep.subr.bf16.mxu1 %v2400_v45 }
 0x17b   :  { %1951 = vmatpush3.bf16.msra.mxu1 %v2554_v2 }
 0x17c   :  { %1976 = vmatprep.subr.bf16.mxu1 %v2400_v45 }
 0x17e   :  { %1578 = vmatmul.mubr.f32.vlgmr.msra.gmra.mrb[2].mxu1 %v361_v17 }
 0x17f   :  { %1978 = vmatpush3.bf16.msra.mxu1 %v2524_v44  ;;  %1647 = vmatprep.mubr.msk.f32.mxu1 %vm2401_vm2, %v2402_v3 }
 0x180   :  { %1979 = vmatprep.subr.bf16.mxu1 %v2400_v45 }
 0x183   :  { %1981 = vmatpush3.bf16.msra.mxu1 %v2530_v48 }
 0x184   :  { %1982 = vmatprep.subr.bf16.mxu1 %v2400_v45 }
 0x187   :  { %1984 = vmatpush3.bf16.msra.mxu1 %v2534_v51 }
 0x188   :  { %1985 = vmatprep.subr.bf16.mxu1 %v2400_v45 }
 0x18b   :  { %1987 = vmatpush3.bf16.msra.mxu1 %v2538_v54 }
 0x18c   :  { %1988 = vmatprep.subr.bf16.mxu1 %v2400_v45 }
 0x18f   :  { %1990 = vmatpush3.bf16.msra.mxu1 %v2542_v57 }
 0x190   :  { %1991 = vmatprep.subr.bf16.mxu1 %v2400_v45 }
 0x193   :  { %1993 = vmatpush3.bf16.msra.mxu1 %v2546_v60 }
 0x194   :  { %1994 = vmatprep.subr.bf16.mxu1 %v2400_v45 }
 0x197   :  { %1996 = vmatpush3.bf16.msra.mxu1 %v2550_v63 }
 0x198   :  { %1997 = vmatprep.subr.bf16.mxu1 %v2400_v45 }
 0x19b   :  { %1999 = vmatpush3.bf16.msra.mxu1 %v2554_v2 }
 0x19c   :  { %2024 = vmatprep.subr.bf16.mxu1 %v2400_v45 }
 0x231   :  { %v1389_v18 = vpop.f32.mrb[0].mxu1 }
 0x232   :  { %v1390_v19 = vpop.f32.mrb[1].mxu1 }
 0x233   :  { %v1391_v20 = vadd.f32 %v1390_v19, %v1389_v18 }
 0x235   :  { %v2606_v22 = vadd.f32 %v1391_v20, %v1347_v21 }
 0x251   :  { %v429_v23 = vpop.f32.mrb[2].mxu1 }
 0x252   :  { %v433_v24 = vadd.f32 %v429_v23, %v2606_v22  ;;  %v1579_v25 = vpop.f32.mrb[3].mxu1 }
 0x254   :  { %v1348_v26 = vmul.f32 -1.442695, %v433_v24 }
 0x256   :  { %2161 = vpow2.f32 %v1348_v26 }
 0x257   :  { %2163 = vtanh.f32 %v433_v24 }
 0x260   :  { %v2162_v27 = vpop.eup %2161 }
 0x261   :  { %v438_v28 = vadd.f32 1.0, %v2162_v27  ;;  %v2164_v31 = vpop.eup %2163 }
 0x263   :  { %2165 = vrcp.f32 %v438_v28 }
 0x26d   :  { %v2166_v32 = vpop.eup %2165 }
 0x26e   :  { %v441_v33 = vsel %vm2614_vm5, %v2164_v31, %v2166_v32 }
 0x26f   :  { %446 = vrot.lane.b32.xlu1 %v441_v33, %s2403_s24  ;;  %442 = vrot.lane.b32.xlu0 %v441_v33, %s2404_s25 }
 0x273   :  { %444 = vrot.lane.b32.xlu0 %v441_v33, %s2405_s26 }
 0x2e1   :  { %v443_v34 = vpop.permute.xlu0 %442  ;;  %v447_v41 = vpop.permute.xlu1 %446 }
 0x2e2   :  { %v448_v37 = vmul.f32 %v443_v34, %v362_v35 }
 0x2e5   :  { %v445_v36 = vpop.permute.xlu0 %444 }
 0x2e6   :  { %v449_v38 = vmul.f32 %v445_v36, %v441_v33 }
 0x2e8   :  { %v450_v39 = vadd.f32 %v449_v38, %v448_v37 }
 0x2ea   :  { %2167 = vtanh.f32 %v450_v39 }
 0x2f4   :  { %v2168_v40 = vpop.eup %2167 }
 0x2f5   :  { %v2626_v42 = vmul.f32 %v2168_v40, %v447_v41 }
 0x2f7   :  { %1613 = vmatmul.mubr.f32.vlgmr.msra.gmra.mrb[2].mxu0 %v2626_v42 }
 0x2f8   :  { %2002 = vmatpush3.bf16.msra.mxu0 %v2524_v44  ;;  %1682 = vmatprep.mubr.msk.f32.mxu0 %vm2401_vm2, %v2402_v3 }
 0x2f9   :  { %2003 = vmatprep.subr.bf16.mxu0 %v2400_v45 }
 0x2fc   :  { %2005 = vmatpush3.bf16.msra.mxu0 %v2530_v48 }
 0x2fd   :  { %2006 = vmatprep.subr.bf16.mxu0 %v2400_v45 }
 0x300   :  { %2008 = vmatpush3.bf16.msra.mxu0 %v2534_v51 }
 0x301   :  { %2009 = vmatprep.subr.bf16.mxu0 %v2400_v45 }
 0x304   :  { %2011 = vmatpush3.bf16.msra.mxu0 %v2538_v54 }
 0x305   :  { %2012 = vmatprep.subr.bf16.mxu0 %v2400_v45 }
 0x308   :  { %2014 = vmatpush3.bf16.msra.mxu0 %v2542_v57 }
 0x309   :  { %2015 = vmatprep.subr.bf16.mxu0 %v2400_v45 }
 0x30c   :  { %2017 = vmatpush3.bf16.msra.mxu0 %v2546_v60 }
 0x30d   :  { %2018 = vmatprep.subr.bf16.mxu0 %v2400_v45 }
 0x310   :  { %2020 = vmatpush3.bf16.msra.mxu0 %v2550_v63 }
 0x311   :  { %2021 = vmatprep.subr.bf16.mxu0 %v2400_v45 }
 0x314   :  { %2023 = vmatpush3.bf16.msra.mxu0 %v2554_v2 }
 0x315   :  { %2048 = vmatprep.subr.bf16.mxu0 %v2400_v45 }
 0x3ca   :  { %v519_v43 = vpop.f32.mrb[2].mxu0 }
 0x3cb   :  { %v524_v46 = vrot.slane %v519_v43, 7  ;;  %v1614_v47 = vpop.f32.mrb[3].mxu0 }
 0x3cd   :  { %v526_v49 = vadd.f32 %v524_v46, %v2606_v22 }
 0x3cf   :  { %v1349_v50 = vmul.f32 -1.442695, %v526_v49 }
 0x3d1   :  { %2169 = vpow2.f32 %v1349_v50 }
 0x3d2   :  { %2171 = vtanh.f32 %v526_v49 }
 0x3db   :  { %v2170_v52 = vpop.eup %2169 }
 0x3dc   :  { %v531_v53 = vadd.f32 1.0, %v2170_v52  ;;  %v2172_v55 = vpop.eup %2171 }
 0x3de   :  { %2173 = vrcp.f32 %v531_v53 }
 0x3e8   :  { %v2174_v56 = vpop.eup %2173 }
 0x3e9   :  { %v534_v58 = vsel %vm2614_vm5, %v2172_v55, %v2174_v56 }
 0x3ea   :  { %v536_v59 = vrot.slane %v534_v58, 1 }
 0x3ec   :  { %538 = vrot.lane.b32.xlu0 %v536_v59, %s2404_s25  ;;  %540 = vrot.lane.b32.xlu1 %v536_v59, %s2405_s26 }
 0x3f0   :  { %542 = vrot.lane.b32.xlu1 %v536_v59, %s2403_s24 }
 0x45e   :  { %v541_v61 = vpop.permute.xlu1 %540  ;;  %v539_v0 = vpop.permute.xlu0 %538 }
 0x45f   :  { %v546_v62 = vrot.slane %v541_v61, 7  ;;  %v544_v4 = vmul.f32 %v539_v0, %v450_v39 }
 0x461   :  { %v548_v1 = vmul.f32 %v546_v62, %v534_v58 }
 0x462   :  { %v543_v8 = vpop.permute.xlu1 %542 }
 0x463   :  { %v550_v5 = vrot.slane %v548_v1, 1 }
 0x465   :  { %v552_v6 = vadd.f32 %v550_v5, %v544_v4 }
 0x467   :  { %2175 = vtanh.f32 %v552_v6 }
 0x471   :  { %v2176_v7 = vpop.eup %2175 }
 0x472   :  { %v554_v9 = vmul.f32 %v2176_v7, %v543_v8 }
 0x474   :  { %1648 = vmatmul.mubr.f32.vlgmr.msra.gmra.mrb[4].mxu1 %v554_v9  ;;  %v1168_v32 = vrot.slane %v554_v9, 7 }
 0x475   :  { %2026 = vmatpush3.bf16.msra.mxu1 %v2524_v44  ;;  %1717 = vmatprep.mubr.msk.f32.mxu1 %vm2401_vm2, %v2402_v3 }
 0x476   :  { %2027 = vmatprep.subr.bf16.mxu1 %v2400_v45  ;;  %v1189_v36 = vsel %vm1188_vm6, %v2626_v42, %v1168_v32 }
 0x479   :  { %2029 = vmatpush3.bf16.msra.mxu1 %v2530_v48 }
 0x47a   :  { %2030 = vmatprep.subr.bf16.mxu1 %v2400_v45 }
 0x47d   :  { %2032 = vmatpush3.bf16.msra.mxu1 %v2534_v51 }
 0x47e   :  { %2033 = vmatprep.subr.bf16.mxu1 %v2400_v45 }
 0x481   :  { %2035 = vmatpush3.bf16.msra.mxu1 %v2538_v54 }
 0x482   :  { %2036 = vmatprep.subr.bf16.mxu1 %v2400_v45 }
 0x485   :  { %2038 = vmatpush3.bf16.msra.mxu1 %v2542_v57 }
 0x486   :  { %2039 = vmatprep.subr.bf16.mxu1 %v2400_v45 }
 0x489   :  { %2041 = vmatpush3.bf16.msra.mxu1 %v2546_v60 }
 0x48a   :  { %2042 = vmatprep.subr.bf16.mxu1 %v2400_v45 }
 0x48d   :  { %2044 = vmatpush3.bf16.msra.mxu1 %v2550_v63 }
 0x48e   :  { %2045 = vmatprep.subr.bf16.mxu1 %v2400_v45 }
 0x491   :  { %2047 = vmatpush3.bf16.msra.mxu1 %v2554_v2 }
 0x492   :  { %2072 = vmatprep.subr.bf16.mxu1 %v2400_v45 }
 0x547   :  { %v621_v10 = vpop.f32.mrb[4].mxu1 }
 0x548   :  { %v626_v11 = vrot.slane %v621_v10, 6  ;;  %v1649_v12 = vpop.f32.mrb[5].mxu1 }
 0x54a   :  { %v628_v13 = vadd.f32 %v626_v11, %v2606_v22 }
 0x54c   :  { %v1350_v14 = vmul.f32 -1.442695, %v628_v13 }
 0x54e   :  { %2177 = vpow2.f32 %v1350_v14 }
 0x54f   :  { %2179 = vtanh.f32 %v628_v13 }
 0x558   :  { %v2178_v15 = vpop.eup %2177 }
 0x559   :  { %v633_v16 = vadd.f32 1.0, %v2178_v15  ;;  %v2180_v17 = vpop.eup %2179 }
 0x55b   :  { %2181 = vrcp.f32 %v633_v16 }
 0x565   :  { %v2182_v18 = vpop.eup %2181 }
 0x566   :  { %v636_v19 = vsel %vm2614_vm5, %v2180_v17, %v2182_v18 }
 0x567   :  { %v638_v20 = vrot.slane %v636_v19, 2 }
 0x569   :  { %640 = vrot.lane.b32.xlu1 %v638_v20, %s2404_s25  ;;  %642 = vrot.lane.b32.xlu0 %v638_v20, %s2405_s26 }
 0x56d   :  { %644 = vrot.lane.b32.xlu0 %v638_v20, %s2403_s24 }
 0x5db   :  { %v643_v21 = vpop.permute.xlu0 %642  ;;  %v641_v24 = vpop.permute.xlu1 %640 }
 0x5dc   :  { %v648_v23 = vrot.slane %v643_v21, 6  ;;  %v646_v26 = vmul.f32 %v641_v24, %v552_v6 }
 0x5de   :  { %v650_v25 = vmul.f32 %v648_v23, %v636_v19 }
 0x5df   :  { %v645_v33 = vpop.permute.xlu0 %644 }
 0x5e0   :  { %v652_v27 = vrot.slane %v650_v25, 2 }
 0x5e2   :  { %v654_v28 = vadd.f32 %v652_v27, %v646_v26 }
 0x5e4   :  { %2183 = vtanh.f32 %v654_v28 }
 0x5ee   :  { %v2184_v31 = vpop.eup %2183 }
 0x5ef   :  { %v656_v34 = vmul.f32 %v2184_v31, %v645_v33 }
 0x5f1   :  { %v1171_v35 = vrot.slane %v656_v34, 6  ;;  %1683 = vmatmul.mubr.f32.vlgmr.msra.gmra.mrb[4].mxu0 %v656_v34 }
 0x5f2   :  { %2050 = vmatpush3.bf16.msra.mxu0 %v2524_v44  ;;  %1752 = vmatprep.mubr.msk.f32.mxu0 %vm2401_vm2, %v2402_v3 }
 0x5f3   :  { %v1191_v37 = vsel %vm1190_vm7, %v1189_v36, %v1171_v35  ;;  %2051 = vmatprep.subr.bf16.mxu0 %v2400_v45 }
 0x5f6   :  { %2053 = vmatpush3.bf16.msra.mxu0 %v2530_v48 }
 0x5f7   :  { %2054 = vmatprep.subr.bf16.mxu0 %v2400_v45 }
 0x5fa   :  { %2056 = vmatpush3.bf16.msra.mxu0 %v2534_v51 }
 0x5fb   :  { %2057 = vmatprep.subr.bf16.mxu0 %v2400_v45 }
 0x5fe   :  { %2059 = vmatpush3.bf16.msra.mxu0 %v2538_v54 }
 0x5ff   :  { %2060 = vmatprep.subr.bf16.mxu0 %v2400_v45 }
 0x602   :  { %2062 = vmatpush3.bf16.msra.mxu0 %v2542_v57 }
 0x603   :  { %2063 = vmatprep.subr.bf16.mxu0 %v2400_v45 }
 0x606   :  { %2065 = vmatpush3.bf16.msra.mxu0 %v2546_v60 }
 0x607   :  { %2066 = vmatprep.subr.bf16.mxu0 %v2400_v45 }
 0x60a   :  { %2068 = vmatpush3.bf16.msra.mxu0 %v2550_v63 }
 0x60b   :  { %2069 = vmatprep.subr.bf16.mxu0 %v2400_v45 }
 0x60e   :  { %2071 = vmatpush3.bf16.msra.mxu0 %v2554_v2 }
 0x60f   :  { %2096 = vmatprep.subr.bf16.mxu0 %v2400_v45 }
 0x6c4   :  { %v723_v38 = vpop.f32.mrb[4].mxu0 }
 0x6c5   :  { %v728_v39 = vrot.slane %v723_v38, 5  ;;  %v1684_v40 = vpop.f32.mrb[5].mxu0 }
 0x6c7   :  { %v730_v41 = vadd.f32 %v728_v39, %v2606_v22 }
 0x6c9   :  { %v1351_v42 = vmul.f32 -1.442695, %v730_v41 }
 0x6cb   :  { %2185 = vpow2.f32 %v1351_v42 }
 0x6cc   :  { %2187 = vtanh.f32 %v730_v41 }
 0x6d5   :  { %v2186_v43 = vpop.eup %2185 }
 0x6d6   :  { %v735_v46 = vadd.f32 1.0, %v2186_v43  ;;  %v2188_v47 = vpop.eup %2187 }
 0x6d8   :  { %2189 = vrcp.f32 %v735_v46 }
 0x6e2   :  { %v2190_v49 = vpop.eup %2189 }
 0x6e3   :  { %v738_v50 = vsel %vm2614_vm5, %v2188_v47, %v2190_v49 }
 0x6e4   :  { %v740_v52 = vrot.slane %v738_v50, 3 }
 0x6e6   :  { %742 = vrot.lane.b32.xlu0 %v740_v52, %s2404_s25  ;;  %744 = vrot.lane.b32.xlu1 %v740_v52, %s2405_s26 }
 0x6ea   :  { %746 = vrot.lane.b32.xlu1 %v740_v52, %s2403_s24 }
 0x758   :  { %v745_v53 = vpop.permute.xlu1 %744  ;;  %v743_v56 = vpop.permute.xlu0 %742 }
 0x759   :  { %v750_v55 = vrot.slane %v745_v53, 5  ;;  %v748_v59 = vmul.f32 %v743_v56, %v654_v28 }
 0x75b   :  { %v752_v58 = vmul.f32 %v750_v55, %v738_v50 }
 0x75c   :  { %v747_v1 = vpop.permute.xlu1 %746 }
 0x75d   :  { %v754_v61 = vrot.slane %v752_v58, 3 }
 0x75f   :  { %v756_v62 = vadd.f32 %v754_v61, %v748_v59 }
 0x761   :  { %2191 = vtanh.f32 %v756_v62 }
 0x76b   :  { %v2192_v0 = vpop.eup %2191 }
 0x76c   :  { %v758_v4 = vmul.f32 %v2192_v0, %v747_v1 }
 0x76e   :  { %v1174_v5 = vrot.slane %v758_v4, 5  ;;  %1718 = vmatmul.mubr.f32.vlgmr.msra.gmra.mrb[6].mxu1 %v758_v4 }
 0x76f   :  { %2074 = vmatpush3.bf16.msra.mxu1 %v2524_v44  ;;  %1787 = vmatprep.mubr.msk.f32.mxu1 %vm2401_vm2, %v2402_v3 }
 0x770   :  { %v1193_v6 = vsel %vm1192_vm8, %v1191_v37, %v1174_v5  ;;  %2075 = vmatprep.subr.bf16.mxu1 %v2400_v45 }
 0x773   :  { %2077 = vmatpush3.bf16.msra.mxu1 %v2530_v48 }
 0x774   :  { %2078 = vmatprep.subr.bf16.mxu1 %v2400_v45 }
 0x777   :  { %2080 = vmatpush3.bf16.msra.mxu1 %v2534_v51 }
 0x778   :  { %2081 = vmatprep.subr.bf16.mxu1 %v2400_v45 }
 0x77b   :  { %2083 = vmatpush3.bf16.msra.mxu1 %v2538_v54 }
 0x77c   :  { %2084 = vmatprep.subr.bf16.mxu1 %v2400_v45 }
 0x77f   :  { %2086 = vmatpush3.bf16.msra.mxu1 %v2542_v57 }
 0x780   :  { %2087 = vmatprep.subr.bf16.mxu1 %v2400_v45 }
 0x783   :  { %2089 = vmatpush3.bf16.msra.mxu1 %v2546_v60 }
 0x784   :  { %2090 = vmatprep.subr.bf16.mxu1 %v2400_v45 }
 0x787   :  { %2092 = vmatpush3.bf16.msra.mxu1 %v2550_v63 }
 0x788   :  { %2093 = vmatprep.subr.bf16.mxu1 %v2400_v45 }
 0x78b   :  { %2095 = vmatpush3.bf16.msra.mxu1 %v2554_v2 }
 0x78c   :  { %2120 = vmatprep.subr.bf16.mxu1 %v2400_v45 }
 0x841   :  { %v825_v7 = vpop.f32.mrb[6].mxu1 }
 0x842   :  { %v830_v8 = vrot.slane %v825_v7, 4  ;;  %v1719_v9 = vpop.f32.mrb[7].mxu1 }
 0x844   :  { %v832_v10 = vadd.f32 %v830_v8, %v2606_v22 }
 0x846   :  { %v1352_v11 = vmul.f32 -1.442695, %v832_v10 }
 0x848   :  { %2193 = vpow2.f32 %v1352_v11 }
 0x849   :  { %2195 = vtanh.f32 %v832_v10 }
 0x852   :  { %v2194_v12 = vpop.eup %2193 }
 0x853   :  { %v837_v13 = vadd.f32 1.0, %v2194_v12  ;;  %v2196_v14 = vpop.eup %2195 }
 0x855   :  { %2197 = vrcp.f32 %v837_v13 }
 0x85f   :  { %v2198_v15 = vpop.eup %2197 }
 0x860   :  { %v840_v16 = vsel %vm2614_vm5, %v2196_v14, %v2198_v15 }
 0x861   :  { %v842_v17 = vrot.slane %v840_v16, 4 }
 0x863   :  { %844 = vrot.lane.b32.xlu1 %v842_v17, %s2404_s25  ;;  %846 = vrot.lane.b32.xlu0 %v842_v17, %s2405_s26 }
 0x867   :  { %848 = vrot.lane.b32.xlu0 %v842_v17, %s2403_s24 }
 0x8d5   :  { %v847_v18 = vpop.permute.xlu0 %846  ;;  %v845_v20 = vpop.permute.xlu1 %844 }
 0x8d6   :  { %v852_v19 = vrot.slane %v847_v18, 4  ;;  %v850_v23 = vmul.f32 %v845_v20, %v756_v62 }
 0x8d8   :  { %v854_v21 = vmul.f32 %v852_v19, %v840_v16 }
 0x8d9   :  { %v849_v27 = vpop.permute.xlu0 %848 }
 0x8da   :  { %v856_v24 = vrot.slane %v854_v21, 4 }
 0x8dc   :  { %v858_v25 = vadd.f32 %v856_v24, %v850_v23 }
 0x8de   :  { %2199 = vtanh.f32 %v858_v25 }
 0x8e8   :  { %v2200_v26 = vpop.eup %2199 }
 0x8e9   :  { %v860_v28 = vmul.f32 %v2200_v26, %v849_v27 }
 0x8eb   :  { %v1177_v31 = vrot.slane %v860_v28, 4  ;;  %1753 = vmatmul.mubr.f32.vlgmr.msra.gmra.mrb[6].mxu0 %v860_v28 }
 0x8ec   :  { %2098 = vmatpush3.bf16.msra.mxu0 %v2524_v44  ;;  %1822 = vmatprep.mubr.msk.f32.mxu0 %vm2401_vm2, %v2402_v3 }
 0x8ed   :  { %v1195_v32 = vsel %vm1194_vm9, %v1193_v6, %v1177_v31  ;;  %2099 = vmatprep.subr.bf16.mxu0 %v2400_v45 }
 0x8f0   :  { %2101 = vmatpush3.bf16.msra.mxu0 %v2530_v48 }
 0x8f1   :  { %2102 = vmatprep.subr.bf16.mxu0 %v2400_v45 }
 0x8f4   :  { %2104 = vmatpush3.bf16.msra.mxu0 %v2534_v51 }
 0x8f5   :  { %2105 = vmatprep.subr.bf16.mxu0 %v2400_v45 }
 0x8f8   :  { %2107 = vmatpush3.bf16.msra.mxu0 %v2538_v54 }
 0x8f9   :  { %2108 = vmatprep.subr.bf16.mxu0 %v2400_v45 }
 0x8fc   :  { %2110 = vmatpush3.bf16.msra.mxu0 %v2542_v57 }
 0x8fd   :  { %2111 = vmatprep.subr.bf16.mxu0 %v2400_v45 }
 0x900   :  { %2113 = vmatpush3.bf16.msra.mxu0 %v2546_v60 }
 0x901   :  { %2114 = vmatprep.subr.bf16.mxu0 %v2400_v45 }
 0x904   :  { %2116 = vmatpush3.bf16.msra.mxu0 %v2550_v63 }
 0x905   :  { %2117 = vmatprep.subr.bf16.mxu0 %v2400_v45 }
 0x908   :  { %2119 = vmatpush3.bf16.msra.mxu0 %v2554_v2 }
 0x9be   :  { %v927_v44 = vpop.f32.mrb[6].mxu0 }
 0x9bf   :  { %v932_v48 = vrot.slane %v927_v44, 3  ;;  %v1754_v51 = vpop.f32.mrb[7].mxu0 }
 0x9c1   :  { %v934_v54 = vadd.f32 %v932_v48, %v2606_v22 }
 0x9c3   :  { %v1353_v33 = vmul.f32 -1.442695, %v934_v54 }
 0x9c5   :  { %2201 = vpow2.f32 %v1353_v33 }
 0x9c6   :  { %2203 = vtanh.f32 %v934_v54 }
 0x9cf   :  { %v2202_v57 = vpop.eup %2201 }
 0x9d0   :  { %v939_v34 = vadd.f32 1.0, %v2202_v57  ;;  %v2204_v60 = vpop.eup %2203 }
 0x9d2   :  { %2205 = vrcp.f32 %v939_v34 }
 0x9dc   :  { %v2206_v35 = vpop.eup %2205 }
 0x9dd   :  { %v942_v63 = vsel %vm2614_vm5, %v2204_v60, %v2206_v35 }
 0x9de   :  { %v944_v36 = vrot.slane %v942_v63, 5 }
 0x9e0   :  { %946 = vrot.lane.b32.xlu0 %v944_v36, %s2404_s25  ;;  %948 = vrot.lane.b32.xlu1 %v944_v36, %s2405_s26 }
 0x9e4   :  { %950 = vrot.lane.b32.xlu1 %v944_v36, %s2403_s24  ;;  %v1216_v36 = vld [vmem:[#allocation10] sm:$0xff] }
 0xa52   :  { %v949_v2 = vpop.permute.xlu1 %948  ;;  %v947_v38 = vpop.permute.xlu0 %946 }
 0xa53   :  { %v954_v37 = vrot.slane %v949_v2, 3  ;;  %v952_v40 = vmul.f32 %v947_v38, %v858_v25  ;;  %v1217_v2 = vld [vmem:[#allocation10 + $0x8] sm:$0xff] }
 0xa54   :  { %v2121_v38 = vpack.c.bf16 %v1217_v2, %v1216_v36 }
 0xa55   :  { %v956_v39 = vmul.f32 %v954_v37, %v942_v63  ;;  %v1218_v37 = vld [vmem:[#allocation10 + $0x10] sm:$0xff] }
 0xa56   :  { %v951_v46 = vpop.permute.xlu1 %950 }
 0xa57   :  { %v958_v41 = vrot.slane %v956_v39, 5  ;;  %v1219_v39 = vld [vmem:[#allocation10 + $0x18] sm:$0xff] }
 0xa59   :  { %v960_v42 = vadd.f32 %v958_v41, %v952_v40  ;;  %v2124_v40 = vpack.c.bf16 %v1219_v39, %v1218_v37  ;;  %v1220_v41 = vld [vmem:[#allocation10 + $0x20] sm:$0xff] }
 0xa5b   :  { %2207 = vtanh.f32 %v960_v42 }
 0xa65   :  { %v2208_v43 = vpop.eup %2207 }
 0xa66   :  { %v962_v47 = vmul.f32 %v2208_v43, %v951_v46  ;;  %v1222_v46 = vld [vmem:[#allocation10 + $0x30] sm:$0xff] }
 0xa68   :  { %v1180_v49 = vrot.slane %v962_v47, 3  ;;  %1788 = vmatmul.mubr.f32.vlgmr.msra.gmra.mrb[8].mxu1 %v962_v47  ;;  %v1223_v47 = vld [vmem:[#allocation10 + $0x38] sm:$0xff] }
 0xa69   :  { %1857 = vmatprep.mubr.msk.f32.mxu1 %vm2401_vm2, %v2402_v3  ;;  %2122 = vmatpush3.bf16.msra.mxu1 %v2121_v38 }
 0xa6a   :  { %v1197_v50 = vsel %vm1196_vm10, %v1195_v32, %v1180_v49  ;;  %2123 = vmatprep.subr.bf16.mxu1 %v2400_v45  ;;  %v2130_v49 = vpack.c.bf16 %v1223_v47, %v1222_v46 }
 0xa6d   :  { %2125 = vmatpush3.bf16.msra.mxu1 %v2124_v40 }
 0xa6e   :  { %2126 = vmatprep.subr.bf16.mxu1 %v2400_v45 }
 0xb3b   :  { %v1029_v52 = vpop.f32.mrb[8].mxu1 }
 0xb3c   :  { %v1034_v53 = vrot.slane %v1029_v52, 2  ;;  %v1789_v55 = vpop.f32.mrb[9].mxu1 }
 0xb3e   :  { %v1036_v56 = vadd.f32 %v1034_v53, %v2606_v22 }
 0xb40   :  { %v1354_v58 = vmul.f32 -1.442695, %v1036_v56 }
 0xb42   :  { %2209 = vpow2.f32 %v1354_v58  ;;  %v1224_v58 = vld [vmem:[#allocation10 + $0x40] sm:$0xff] }
 0xb43   :  { %2211 = vtanh.f32 %v1036_v56 }
 0xb4c   :  { %v2210_v59 = vpop.eup %2209 }
 0xb4d   :  { %v1041_v61 = vadd.f32 1.0, %v2210_v59  ;;  %v2212_v62 = vpop.eup %2211  ;;  %v1225_v59 = vld [vmem:[#allocation10 + $0x48] sm:$0xff] }
 0xb4f   :  { %2213 = vrcp.f32 %v1041_v61  ;;  %v2133_v61 = vpack.c.bf16 %v1225_v59, %v1224_v58 }
 0xb59   :  { %v2214_v0 = vpop.eup %2213 }
 0xb5a   :  { %v1044_v1 = vsel %vm2614_vm5, %v2212_v62, %v2214_v0  ;;  %v1226_v62 = vld [vmem:[#allocation10 + $0x50] sm:$0xff]  ;;  %v1227_v0 = vld [vmem:[#allocation10 + $0x58] sm:$0xff] }
 0xb5b   :  { %v1046_v4 = vrot.slane %v1044_v1, 6 }
 0xb5d   :  { %1048 = vrot.lane.b32.xlu1 %v1046_v4, %s2404_s25  ;;  %1050 = vrot.lane.b32.xlu0 %v1046_v4, %s2405_s26 }
 0xb61   :  { %1052 = vrot.lane.b32.xlu0 %v1046_v4, %s2403_s24  ;;  %v1228_v4 = vld [vmem:[#allocation10 + $0x60] sm:$0xff] }
 0xbcf   :  { %v1051_v3 = vpop.permute.xlu0 %1050  ;;  %v1049_v6 = vpop.permute.xlu1 %1048 }
 0xbd0   :  { %v1056_v5 = vrot.slane %v1051_v3, 2  ;;  %v1054_v8 = vmul.f32 %v1049_v6, %v960_v42  ;;  %v1221_v42 = vld [vmem:[#allocation10 + $0x28] sm:$0xff]  ;;  %v1230_v6 = vld [vmem:[#allocation10 + $0x70] sm:$0xff] }
 0xbd1   :  { %v2127_v43 = vpack.c.bf16 %v1221_v42, %v1220_v41  ;;  %v1229_v3 = vld [vmem:[#allocation10 + $0x68] sm:$0xff] }
 0xbd2   :  { %v1058_v7 = vmul.f32 %v1056_v5, %v1044_v1  ;;  %v2136_v1 = vpack.c.bf16 %v1227_v0, %v1226_v62  ;;  %v2139_v5 = vpack.c.bf16 %v1229_v3, %v1228_v4 }
 0xbd3   :  { %v1053_v12 = vpop.permute.xlu0 %1052  ;;  %2128 = vmatpush3.bf16.msra.mxu1 %v2127_v43 }
 0xbd4   :  { %v1060_v9 = vrot.slane %v1058_v7, 6  ;;  %2129 = vmatprep.subr.bf16.mxu1 %v2400_v45  ;;  %v1231_v7 = vld [vmem:[#allocation10 + $0x78] sm:$0xff] }
 0xbd5   :  { %v2142_v29 = vpack.c.bf16 %v1231_v7, %v1230_v6 }
 0xbd6   :  { %v1062_v10 = vadd.f32 %v1060_v9, %v1054_v8 }
 0xbd7   :  { %2131 = vmatpush3.bf16.msra.mxu1 %v2130_v49 }
 0xbd8   :  { %2215 = vtanh.f32 %v1062_v10  ;;  %2132 = vmatprep.subr.bf16.mxu1 %v2400_v45 }
 0xbdb   :  { %2134 = vmatpush3.bf16.msra.mxu1 %v2133_v61 }
 0xbdc   :  { %2135 = vmatprep.subr.bf16.mxu1 %v2400_v45 }
 0xbdf   :  { %2137 = vmatpush3.bf16.msra.mxu1 %v2136_v1 }
 0xbe0   :  { %2138 = vmatprep.subr.bf16.mxu1 %v2400_v45 }
 0xbe2   :  { %v2216_v11 = vpop.eup %2215 }
 0xbe3   :  { %v1064_v13 = vmul.f32 %v2216_v11, %v1053_v12  ;;  %2140 = vmatpush3.bf16.msra.mxu1 %v2139_v5 }
 0xbe4   :  { %2141 = vmatprep.subr.bf16.mxu1 %v2400_v45 }
 0xbe5   :  { %v1183_v14 = vrot.slane %v1064_v13, 2  ;;  %1823 = vmatmul.mubr.f32.vlgmr.msra.gmra.mrb[8].mxu0 %v1064_v13 }
 0xbe7   :  { %v1198_v15 = vsel %vm152_vm1, %v1197_v50, %v1183_v14  ;;  %2143 = vmatpush3.bf16.msra.mxu1 %v2142_v29 }
 0xcb8   :  { %v1131_v16 = vpop.f32.mrb[8].mxu0 }
 0xcb9   :  { %v1136_v17 = vrot.slane %v1131_v16, 1  ;;  %v1824_v18 = vpop.f32.mrb[9].mxu0 }
 0xcbb   :  { %v1138_v19 = vadd.f32 %v1136_v17, %v2606_v22 }
 0xcbd   :  { %v1355_v20 = vmul.f32 -1.442695, %v1138_v19 }
 0xcbf   :  { %2217 = vpow2.f32 %v1355_v20 }
 0xcc0   :  { %2219 = vtanh.f32 %v1138_v19 }
 0xcc9   :  { %v2218_v21 = vpop.eup %2217 }
 0xcca   :  { %v1143_v23 = vadd.f32 1.0, %v2218_v21  ;;  %v2220_v24 = vpop.eup %2219 }
 0xccc   :  { %2221 = vrcp.f32 %v1143_v23 }
 0xcd6   :  { %v2222_v25 = vpop.eup %2221 }
 0xcd7   :  { %v1146_v26 = vsel %vm2614_vm5, %v2220_v24, %v2222_v25 }
 0xcd8   :  { %v1148_v27 = vrot.slane %v1146_v26, 7 }
 0xcda   :  { %1150 = vrot.lane.b32.xlu0 %v1148_v27, %s2404_s25  ;;  %1152 = vrot.lane.b32.xlu1 %v1148_v27, %s2405_s26 }
 0xcde   :  { %1154 = vrot.lane.b32.xlu1 %v1148_v27, %s2403_s24 }
 0xd4c   :  { %v1153_v28 = vpop.permute.xlu1 %1152  ;;  %v1151_v31 = vpop.permute.xlu0 %1150 }
 0xd4d   :  { %v1158_v22 = vrot.slane %v1153_v28, 1  ;;  %v1156_v44 = vmul.f32 %v1151_v31, %v1062_v10 }
 0xd4f   :  { %v1160_v32 = vmul.f32 %v1158_v22, %v1146_v26 }
 0xd50   :  { %v1155_v33 = vpop.permute.xlu1 %1154 }
 0xd51   :  { %v1162_v48 = vrot.slane %v1160_v32, 7 }
 0xd53   :  { %v1164_v51 = vadd.f32 %v1162_v48, %v1156_v44 }
 0xd55   :  { %2223 = vtanh.f32 %v1164_v51  ;;  %v1309_v57 = vrot.slane %v1164_v51, 7 }
 0xd5f   :  { %v2224_v54 = vpop.eup %2223 }
 0xd60   :  { %v1166_v30 = vmul.f32 %v2224_v54, %v1155_v33 }
 0xd62   :  { %v1186_v34 = vrot.slane %v1166_v30, 1  ;;  %v1311_v60 = vsel %vm1188_vm6, %v1166_v30, %v1309_v57 }
 0xd63   :  { %1312 = vst [vmem:[#allocation12] sm:$0x3] %v1311_v60 }
 0xd64   :  { %v1200_v35 = vsel %vm1199_vm11, %v1198_v15, %v1186_v34 }
 0xd65   :  { %v1203_v63 = vsel %vm360_vm12, %v1200_v35, 0.0 }
 0xd66   :  { %1204 = vadd.xlane.f32.xlu0 %v1203_v63 }
 0xdf3   :  { %v1205_v50 = vpop.xlane.xlu0 %1204 }
 0xdf4   :  { %v1206_v52 = vmul.f32 0.03125, %v1205_v50 }
 0xdf6   :  { %v1207_v53 = vsub.f32 %v1200_v35, %v1206_v52 }
 0xdf8   :  { %v1208_v55 = vmul.f32 %v1207_v53, %v1207_v53 }
 0xdfa   :  { %v1209_v56 = vsel %vm360_vm12, %v1208_v55, 0.0 }
 0xdfb   :  { %1210 = vadd.xlane.f32.xlu1 %v1209_v56 }
 0xe88   :  { %v1211_v8 = vpop.xlane.xlu1 %1210 }
 0xe89   :  { %v1212_v9 = vmul.f32 0.03125, %v1211_v8 }
 0xe8b   :  { %v1213_v10 = vadd.f32 1e-05, %v1212_v9 }
 0xe8d   :  { %2225 = vrsqrt.f32 %v1213_v10 }
 0xe97   :  { %v2226_v11 = vpop.eup %2225 }
 0xe98   :  { %v1215_v12 = vmul.f32 %v2226_v11, %v1207_v53 }
 0xe9a   :  { %1858 = vmatmul.mubr.f32.vlgmr.msra.gmra.mrb[10].mxu1 %v1215_v12 }
 0xe9b   :  { %2348 = shalt.err (!%p2345_p2)
}
 0xe9c   :  { %s2349_s22 = scalar_lea.hbm %s2813_s8, 32 }
 0xe9d   :  { %p2350_p3 = scmp.ne.s32.totalorder %s2813_s8, %s2349_s22  ;;  %p2353_p4 = scmp.lt.u32.totalorder %s2349_s22, %s2813_s8 }
 0xe9f   :  { %p2355_p5 = pnand %p2353_p4, %p2350_p3 }
 0xea1   :  { %2358 = shalt.err (!%p2355_p5)
}
 0xea2   :  { %1332 = dma.vmem_to_hbm [thread:$0]  %s1330_s1, 32, %s2813_s8, [#allocation13]   ;;  %v1356_v45 = vld [vmem:[%s2811_s6 + $0x1] ss:$0 sm:$0xff] }
 0xea3   :  { %s2407_s4 = smov [#allocation11]  }
 0xea4   :  { %s1319_s3 = sshll.u32 %s2407_s4, 4  ;;  %s1320_s3 = int_to_ptr.vmem [resolvable:$true] %s1319_s3 }
 0xea5   :  { %s2359_s20 = scalar_lea.vmem %s1320_s3, 128  ;;  %p2364_p7 = scmp.lt.s32.totalorder %s1320_s3, %s1320_s3 }
 0xea6   :  { %p2360_p6 = scmp.ne.s32.totalorder %s1320_s3, %s2359_s20  ;;  %p2365_p8 = scmp.lt.s32.totalorder %s2359_s20, %s2359_s20 }
 0xea8   :  { %p2366_p9 = por %p2365_p8, %p2364_p7 }
 0xeaa   :  { %p2367_p10 = pnand %p2366_p9, %p2360_p6 }
 0xf6d   :  { %v1303_v13 = vpop.f32.mrb[10].mxu1 }
 0xf6e   :  { %v1304_v14 = vadd.f32 %v1356_v45, %v1303_v13  ;;  %v1859_v15 = vpop.f32.mrb[11].mxu1 }
 0xf70   :  { %1307 = vst [vmem:[#allocation11] sm:$0xff] %v1304_v14 }
 0xf71   :  { %2370 = shalt.err (!%p2367_p10)
}
 0xf72   :  { %s2371_s28 = scalar_lea.hbm %s2812_s7, 128 }
 0xf73   :  { %p2372_p11 = scmp.ne.s32.totalorder %s2812_s7, %s2371_s28  ;;  %p2375_p12 = scmp.lt.u32.totalorder %s2371_s28, %s2812_s7 }
 0xf75   :  { %p2377_p13 = pnand %p2375_p12, %p2372_p11 }
 0xf77   :  { %2380 = shalt.err (!%p2377_p13)
}
 0xf78   :  { %1322 = dma.vmem_to_hbm [thread:$0]  %s1320_s3, 128, %s2812_s7, [#allocation4]  }
 0xf79   :  { %2387 = dma.done.wait [#allocation4], 128  }
 0xf7a   :  { %2388 = vsyncadd [#allocation4], 4294967168 }
 0xf7b   :  { %2389 = dma.done.wait [#allocation13], 32  }
 0xf7c   :  { %2390 = vsyncadd [#allocation13], 4294967264 }
 0xf7d   :  { %1339 = vsyncpa [#allocation3], 1 }
 0xf7e   :  { %1340 = vsyncpa [#allocation6], 1 }
 0xf7f   :  { %1341 = vsyncpa [#allocation9], 1 }
 0xf80   :  { %1342 = vsyncpa [#allocation4], 1 }
 0xf81   :  { %1343 = vsyncpa [#allocation13], 1 }

</bundles_post_ra>
